<compile_context>
chip_gen: v6e
topology: v6e:2x2x1
jax: 0.10.0
libtpu: 0.0.40
codegen_flags: <defaults>
</compile_context>

<pallas_src>
import math
from functools import partial

import jax
import jax.numpy as jnp
from jax import lax
from jax.experimental import pallas as pl
from jax.experimental.pallas import tpu as pltpu


# ------------------------------ helpers --------------------------------------
def _resident_spec(shape):
    """Full-array block with a constant index_map: stays resident in VMEM."""
    zeros = (0,) * len(shape)
    return pl.BlockSpec(shape, lambda b: zeros)


def _layer_norm(x, gamma, beta, eps=1e-5):
    mu = jnp.mean(x, axis=-1, keepdims=True)
    var = jnp.mean((x - mu) ** 2, axis=-1, keepdims=True)
    return (x - mu) * lax.rsqrt(var + eps) * gamma + beta


_PAR = pltpu.CompilerParams(dimension_semantics=("parallel",))


# --------------------- input linear + positional embedding -------------------
def _embed_kernel(x_ref, w_ref, b_ref, pos_ref, o_ref):
    # x: (1, T, F) f32, w: (F, E) bf16, b: (1, E) f32, pos: (T, E) f32
    x = x_ref[0].astype(jnp.bfloat16)
    y = jnp.dot(x, w_ref[...], preferred_element_type=jnp.float32)
    o_ref[0] = y + b_ref[...] + pos_ref[...]


def input_embed(feats_bt, w_in, b_in, pos):
    B, T, F = feats_bt.shape
    E = w_in.shape[1]
    return pl.pallas_call(
        _embed_kernel,
        out_shape=jax.ShapeDtypeStruct((B, T, E), jnp.float32),
        grid=(B,),
        in_specs=[
            pl.BlockSpec((1, T, F), lambda b: (b, 0, 0)),
            _resident_spec(w_in.shape),
            _resident_spec(b_in.shape),
            _resident_spec(pos.shape),
        ],
        out_specs=pl.BlockSpec((1, T, E), lambda b: (b, 0, 0)),
        compiler_params=_PAR,
    )(feats_bt, w_in, b_in, pos)


# ----------------------------- encoder layer ----------------------------------
def _encoder_layer_kernel(nhead,
                          x_ref,
                          wq_ref, bq_ref, wk_ref, bk_ref, wv_ref, bv_ref,
                          wo_ref, bo_ref, g1_ref, bt1_ref,
                          w1_ref, b1_ref, w2_ref, b2_ref, g2_ref, bt2_ref,
                          o_ref):
    _, T, E = x_ref.shape
    H = nhead
    dh = E // H
    scale = 1.0 / math.sqrt(dh)

    x = x_ref[0]                                              # (T, E) f32
    xb = jnp.broadcast_to(x.astype(jnp.bfloat16)[None], (H, T, E))

    # --- multi-head self attention, all heads batched (leading batch dim) ---
    qh = jnp.einsum('hte,hed->htd', xb, wq_ref[...],
                    preferred_element_type=jnp.float32) + bq_ref[...]   # (H,T,dh)
    kh = jnp.einsum('hte,hed->htd', xb, wk_ref[...],
                    preferred_element_type=jnp.float32) + bk_ref[...]
    vh = jnp.einsum('hte,hed->htd', xb, wv_ref[...],
                    preferred_element_type=jnp.float32) + bv_ref[...]

    s = jnp.einsum('htd,hsd->hts',
                   qh.astype(jnp.bfloat16), kh.astype(jnp.bfloat16),
                   preferred_element_type=jnp.float32) * scale          # (H,T,T)
    s = s - jnp.max(s, axis=-1, keepdims=True)
    p = jnp.exp(s)
    p = p * pl.reciprocal(jnp.sum(p, axis=-1, keepdims=True), approx=True)

    ctx = jnp.einsum('hts,hsd->htd',
                     p.astype(jnp.bfloat16), vh.astype(jnp.bfloat16),
                     preferred_element_type=jnp.float32)                # (H,T,dh)
    per_head = jnp.einsum('htd,hde->hte',
                          ctx.astype(jnp.bfloat16), wo_ref[...],
                          preferred_element_type=jnp.float32)           # (H,T,E)
    attn = jnp.sum(per_head, axis=0) + bo_ref[...]                      # (T, E)

    # post-LN residual (norm_first=False in PyTorch)
    x = _layer_norm(x + attn, g1_ref[...], bt1_ref[...])

    # --- feed-forward (ReLU) ---
    h = jnp.maximum(
        jnp.dot(x.astype(jnp.bfloat16), w1_ref[...],
                preferred_element_type=jnp.float32) + b1_ref[...], 0.0)
    ff = jnp.dot(h.astype(jnp.bfloat16), w2_ref[...],
                 preferred_element_type=jnp.float32) + b2_ref[...]
    x = _layer_norm(x + ff, g2_ref[...], bt2_ref[...])

    o_ref[0] = x


def encoder_layer(x, lp, nhead):
    B, T, E = x.shape
    args = (x,
            lp["wq"], lp["bq"], lp["wk"], lp["bk"], lp["wv"], lp["bv"],
            lp["wo"], lp["bo"], lp["g1"], lp["bt1"],
            lp["w1"], lp["b1"], lp["w2"], lp["b2"], lp["g2"], lp["bt2"])
    in_specs = ([pl.BlockSpec((1, T, E), lambda b: (b, 0, 0))] +
                [_resident_spec(a.shape) for a in args[1:]])
    return pl.pallas_call(
        partial(_encoder_layer_kernel, nhead),
        out_shape=jax.ShapeDtypeStruct((B, T, E), jnp.float32),
        grid=(B,),
        in_specs=in_specs,
        out_specs=pl.BlockSpec((1, T, E), lambda b: (b, 0, 0)),
        compiler_params=_PAR,
    )(*args)


# ------------------------------- head linear ----------------------------------
def _head_kernel(x_ref, w_ref, b_ref, o_ref):
    y = jnp.dot(x_ref[0].astype(jnp.bfloat16), w_ref[...],
                preferred_element_type=jnp.float32) + b_ref[...]
    o_ref[0] = y


def head_linear(x, w, b):
    B, T, E = x.shape
    O = w.shape[1]
    return pl.pallas_call(
        _head_kernel,
        out_shape=jax.ShapeDtypeStruct((B, T, O), jnp.float32),
        grid=(B,),
        in_specs=[pl.BlockSpec((1, T, E), lambda b: (b, 0, 0)),
                  _resident_spec(w.shape),
                  _resident_spec(b.shape)],
        out_specs=pl.BlockSpec((1, T, O), lambda b: (b, 0, 0)),
        compiler_params=_PAR,
    )(x, w, b)


# ----------------------------- params / wrapper --------------------------------
def init_params(key, feats_dim, out_dim, dim, num_layers, ff_dim, nhead, max_len):
    H = nhead
    dh = dim // H

    def nrm(k, shape, s=0.02):
        return (s * jax.random.normal(k, shape)).astype(jnp.float32)

    keys = jax.random.split(key, 3 + num_layers)
    p = {
        "w_in": nrm(keys[0], (feats_dim, dim)),
        "b_in": jnp.zeros((1, dim), jnp.float32),
        "pos_emb": nrm(keys[1], (max_len, dim)),
        "w_head": nrm(keys[2], (dim, out_dim)),
        "b_head": jnp.zeros((1, out_dim), jnp.float32),
        "layers": [],
    }
    for i in range(num_layers):
        k = jax.random.split(keys[3 + i], 6)
        p["layers"].append({
            # per-head Q/K/V projections (head-wise split of the packed in_proj)
            "wq": nrm(k[0], (H, dim, dh)),
            "bq": jnp.zeros((H, 1, dh), jnp.float32),
            "wk": nrm(k[1], (H, dim, dh)),
            "bk": jnp.zeros((H, 1, dh), jnp.float32),
            "wv": nrm(k[2], (H, dim, dh)),
            "bv": jnp.zeros((H, 1, dh), jnp.float32),
            # out_proj (dim, dim) stored head-wise as (H, dh, dim)
            "wo": nrm(k[3], (H, dh, dim)),
            "bo": jnp.zeros((1, dim), jnp.float32),
            "g1": jnp.ones((1, dim), jnp.float32),
            "bt1": jnp.zeros((1, dim), jnp.float32),
            "w1": nrm(k[4], (dim, ff_dim)),
            "b1": jnp.zeros((1, ff_dim), jnp.float32),
            "w2": nrm(k[5], (ff_dim, dim)),
            "b2": jnp.zeros((1, dim), jnp.float32),
            "g2": jnp.ones((1, dim), jnp.float32),
            "bt2": jnp.zeros((1, dim), jnp.float32),
        })
    return p


def transformer_encoder_forward(params, feats, *, nhead, max_len):
    T, B, _ = feats.shape
    # PyTorch uses arange(min(T, max_len-1)); the subsequent += only works for
    # T <= max_len-1, so enforce the same precondition explicitly.
    assert T <= max_len - 1, "sequence length must be < max_len"

    # sequence-first (PyTorch batch_first=False) -> batch-major for the kernels
    x_bt = jnp.transpose(feats, (1, 0, 2)).astype(jnp.float32)      # (B, T, F)
    pos = params["pos_emb"][:T]                                     # (T, E)

    x = input_embed(x_bt, params["w_in"].astype(jnp.bfloat16), params["b_in"], pos)

    # TODO(synk): src_key_padding_mask / dropout not implemented (eval, mask=None path).
    # TODO(synk): for long sequences, switch to flash-style online-softmax tiled over
    #             keys and stream all layers inside a single pallas_call.
    for lp in params["layers"]:
        lp_bf = dict(lp)
        for name in ("wq", "wk", "wv", "wo", "w1", "w2"):
            lp_bf[name] = lp[name].astype(jnp.bfloat16)
        x = encoder_layer(x, lp_bf, nhead)

    logits_bt = head_linear(x, params["w_head"].astype(jnp.bfloat16), params["b_head"])
    return jnp.transpose(logits_bt, (1, 0, 2))                      # (T, B, out_dim)


# ----------------------------------- main --------------------------------------
if __name__ == "__main__":
    T, B = 8, 2
    feats_dim, out_dim = 16, 8
    dim, num_layers, ff_dim, nhead, max_len = 128, 2, 256, 4, 64

    key = jax.random.PRNGKey(0)
    kp, kx = jax.random.split(key)
    params = init_params(kp, feats_dim, out_dim, dim, num_layers, ff_dim, nhead, max_len)
    feats = jax.random.normal(kx, (T, B, feats_dim), jnp.float32)

    fwd = jax.jit(partial(transformer_encoder_forward, nhead=nhead, max_len=max_len))
    logits = jax.block_until_ready(fwd(params, feats))

    assert logits.shape == (T, B, out_dim), logits.shape
    assert bool(jnp.all(jnp.isfinite(logits)))
    print("KERNEL_OK")
</pallas_src>

<mosaic_0001>
module attributes {stable_mosaic.version = 11 : i64} {
  func.func @_embed_kernel(%arg0: i32, %arg1: memref<1x8x16xf32, #tpu.memory_space<vmem>>, %arg2: memref<16x128xbf16, #tpu.memory_space<vmem>>, %arg3: memref<1x128xf32, #tpu.memory_space<vmem>>, %arg4: memref<8x128xf32, #tpu.memory_space<vmem>>, %arg5: memref<1x8x128xf32, #tpu.memory_space<vmem>>) attributes {dimension_semantics = [#tpu.dimension_semantics<parallel>], iteration_bounds = array<i64: 2>, scalar_prefetch = 0 : i64, scratch_operands = 0 : i64, tpu.core_type = #tpu.core_type<tc>, window_params = [{transform_indices = @transform_0, window_bounds = array<i64: 1, 8, 16>}, {pipeline_mode = #tpu.pipeline_mode<synchronous>, transform_indices = @transform_1, window_bounds = array<i64: 16, 128>}, {pipeline_mode = #tpu.pipeline_mode<synchronous>, transform_indices = @transform_2, window_bounds = array<i64: 1, 128>}, {pipeline_mode = #tpu.pipeline_mode<synchronous>, transform_indices = @transform_3, window_bounds = array<i64: 8, 128>}, {transform_indices = @transform_4, window_bounds = array<i64: 1, 8, 128>}]} {
    %c0 = arith.constant 0 : index
    %c0_0 = arith.constant 0 : index
    %c0_1 = arith.constant 0 : index
    %0 = vector.load %arg1[%c0, %c0_0, %c0_1] : memref<1x8x16xf32, #tpu.memory_space<vmem>>, vector<1x8x16xf32>
    %1 = vector.shape_cast %0 : vector<1x8x16xf32> to vector<8x16xf32>
    %2 = arith.truncf %1 : vector<8x16xf32> to vector<8x16xbf16>
    %c0_2 = arith.constant 0 : index
    %c0_3 = arith.constant 0 : index
    %3 = vector.load %arg2[%c0_2, %c0_3] : memref<16x128xbf16, #tpu.memory_space<vmem>>, vector<16x128xbf16>
    %cst = arith.constant dense<0.000000e+00> : vector<8x128xf32>
    %4 = tpu.matmul %2, %3, %cst {dimension_numbers = #tpu.dot_dimension_numbers<[1], [0], [0], [1], [0, 0, 1, 1], [], []>} : vector<8x16xbf16>, vector<16x128xbf16>, vector<8x128xf32> -> vector<8x128xf32>
    %c0_4 = arith.constant 0 : index
    %c0_5 = arith.constant 0 : index
    %5 = vector.load %arg3[%c0_4, %c0_5] : memref<1x128xf32, #tpu.memory_space<vmem>>, vector<1x128xf32>
    %6 = vector.broadcast %5 : vector<1x128xf32> to vector<8x128xf32>
    %7 = arith.addf %4, %6 : vector<8x128xf32>
    %c0_6 = arith.constant 0 : index
    %c0_7 = arith.constant 0 : index
    %8 = vector.load %arg4[%c0_6, %c0_7] : memref<8x128xf32, #tpu.memory_space<vmem>>, vector<8x128xf32>
    %9 = arith.addf %7, %8 : vector<8x128xf32>
    %c0_8 = arith.constant 0 : index
    %c0_9 = arith.constant 0 : index
    %c0_10 = arith.constant 0 : index
    %10 = vector.load %arg5[%c0_8, %c0_9, %c0_10] : memref<1x8x128xf32, #tpu.memory_space<vmem>>, vector<1x8x128xf32>
    %11 = vector.shape_cast %10 : vector<1x8x128xf32> to vector<8x128xf32>
    %12 = vector.shape_cast %9 : vector<8x128xf32> to vector<1x8x128xf32>
    tpu.vector_store %arg5[%c0_8, %c0_9, %c0_10], %12 {strides = array<i32>} : memref<1x8x128xf32, #tpu.memory_space<vmem>>, vector<1x8x128xf32>,
    return
  }
  func.func @transform_0(%arg0: i32) -> (i32, i32, i32) {
    %c0_i32 = arith.constant 0 : i32
    %c0_i32_0 = arith.constant 0 : i32
    %c0_i32_1 = arith.constant 0 : i32
    return %arg0, %c0_i32, %c0_i32_0 : i32, i32, i32
  }
  func.func @transform_1(%arg0: i32) -> (i32, i32) {
    %c0_i32 = arith.constant 0 : i32
    %c0_i32_0 = arith.constant 0 : i32
    %c0_i32_1 = arith.constant 0 : i32
    return %c0_i32, %c0_i32_0 : i32, i32
  }
  func.func @transform_2(%arg0: i32) -> (i32, i32) {
    %c0_i32 = arith.constant 0 : i32
    %c0_i32_0 = arith.constant 0 : i32
    %c0_i32_1 = arith.constant 0 : i32
    return %c0_i32, %c0_i32_0 : i32, i32
  }
  func.func @transform_3(%arg0: i32) -> (i32, i32) {
    %c0_i32 = arith.constant 0 : i32
    %c0_i32_0 = arith.constant 0 : i32
    %c0_i32_1 = arith.constant 0 : i32
    return %c0_i32, %c0_i32_0 : i32, i32
  }
  func.func @transform_4(%arg0: i32) -> (i32, i32, i32) {
    %c0_i32 = arith.constant 0 : i32
    %c0_i32_0 = arith.constant 0 : i32
    %c0_i32_1 = arith.constant 0 : i32
    return %arg0, %c0_i32, %c0_i32_0 : i32, i32, i32
  }
}

module attributes {stable_mosaic.version = 11 : i64} {
  func.func @_encoder_layer_kernel(%arg0: i32, %arg1: memref<1x8x128xf32, #tpu.memory_space<vmem>>, %arg2: memref<4x128x32xbf16, #tpu.memory_space<vmem>>, %arg3: memref<4x1x32xf32, #tpu.memory_space<vmem>>, %arg4: memref<4x128x32xbf16, #tpu.memory_space<vmem>>, %arg5: memref<4x1x32xf32, #tpu.memory_space<vmem>>, %arg6: memref<4x128x32xbf16, #tpu.memory_space<vmem>>, %arg7: memref<4x1x32xf32, #tpu.memory_space<vmem>>, %arg8: memref<4x32x128xbf16, #tpu.memory_space<vmem>>, %arg9: memref<1x128xf32, #tpu.memory_space<vmem>>, %arg10: memref<1x128xf32, #tpu.memory_space<vmem>>, %arg11: memref<1x128xf32, #tpu.memory_space<vmem>>, %arg12: memref<128x256xbf16, #tpu.memory_space<vmem>>, %arg13: memref<1x256xf32, #tpu.memory_space<vmem>>, %arg14: memref<256x128xbf16, #tpu.memory_space<vmem>>, %arg15: memref<1x128xf32, #tpu.memory_space<vmem>>, %arg16: memref<1x128xf32, #tpu.memory_space<vmem>>, %arg17: memref<1x128xf32, #tpu.memory_space<vmem>>, %arg18: memref<1x8x128xf32, #tpu.memory_space<vmem>>) attributes {dimension_semantics = [#tpu.dimension_semantics<parallel>], iteration_bounds = array<i64: 2>, scalar_prefetch = 0 : i64, scratch_operands = 0 : i64, tpu.core_type = #tpu.core_type<tc>, window_params = [{transform_indices = @transform_0, window_bounds = array<i64: 1, 8, 128>}, {pipeline_mode = #tpu.pipeline_mode<synchronous>, transform_indices = @transform_1, window_bounds = array<i64: 4, 128, 32>}, {pipeline_mode = #tpu.pipeline_mode<synchronous>, transform_indices = @transform_2, window_bounds = array<i64: 4, 1, 32>}, {pipeline_mode = #tpu.pipeline_mode<synchronous>, transform_indices = @transform_3, window_bounds = array<i64: 4, 128, 32>}, {pipeline_mode = #tpu.pipeline_mode<synchronous>, transform_indices = @transform_4, window_bounds = array<i64: 4, 1, 32>}, {pipeline_mode = #tpu.pipeline_mode<synchronous>, transform_indices = @transform_5, window_bounds = array<i64: 4, 128, 32>}, {pipeline_mode = #tpu.pipeline_mode<synchronous>, transform_indices = @transform_6, window_bounds = array<i64: 4, 1, 32>}, {pipeline_mode = #tpu.pipeline_mode<synchronous>, transform_indices = @transform_7, window_bounds = array<i64: 4, 32, 128>}, {pipeline_mode = #tpu.pipeline_mode<synchronous>, transform_indices = @transform_8, window_bounds = array<i64: 1, 128>}, {pipeline_mode = #tpu.pipeline_mode<synchronous>, transform_indices = @transform_9, window_bounds = array<i64: 1, 128>}, {pipeline_mode = #tpu.pipeline_mode<synchronous>, transform_indices = @transform_10, window_bounds = array<i64: 1, 128>}, {pipeline_mode = #tpu.pipeline_mode<synchronous>, transform_indices = @transform_11, window_bounds = array<i64: 128, 256>}, {pipeline_mode = #tpu.pipeline_mode<synchronous>, transform_indices = @transform_12, window_bounds = array<i64: 1, 256>}, {pipeline_mode = #tpu.pipeline_mode<synchronous>, transform_indices = @transform_13, window_bounds = array<i64: 256, 128>}, {pipeline_mode = #tpu.pipeline_mode<synchronous>, transform_indices = @transform_14, window_bounds = array<i64: 1, 128>}, {pipeline_mode = #tpu.pipeline_mode<synchronous>, transform_indices = @transform_15, window_bounds = array<i64: 1, 128>}, {pipeline_mode = #tpu.pipeline_mode<synchronous>, transform_indices = @transform_16, window_bounds = array<i64: 1, 128>}, {transform_indices = @transform_17, window_bounds = array<i64: 1, 8, 128>}]} {
    %c0 = arith.constant 0 : index
    %c0_0 = arith.constant 0 : index
    %c0_1 = arith.constant 0 : index
    %0 = vector.load %arg1[%c0, %c0_0, %c0_1] : memref<1x8x128xf32, #tpu.memory_space<vmem>>, vector<1x8x128xf32>
    %1 = vector.shape_cast %0 : vector<1x8x128xf32> to vector<8x128xf32>
    %2 = arith.truncf %1 : vector<8x128xf32> to vector<8x128xbf16>
    %3 = vector.shape_cast %2 : vector<8x128xbf16> to vector<1x8x128xbf16>
    %4 = vector.shape_cast %3 : vector<1x8x128xbf16> to vector<1x8x128xbf16>
    %5 = vector.broadcast %4 : vector<1x8x128xbf16> to vector<4x8x128xbf16>
    %c0_2 = arith.constant 0 : index
    %c0_3 = arith.constant 0 : index
    %c0_4 = arith.constant 0 : index
    %6 = vector.load %arg2[%c0_2, %c0_3, %c0_4] : memref<4x128x32xbf16, #tpu.memory_space<vmem>>, vector<4x128x32xbf16>
    "tpu.trace_start"() <{level = 10 : i32, message = "hte,hed->htd"}> : () -> ()
    %cst = arith.constant dense<0.000000e+00> : vector<4x8x32xf32>
    %7 = tpu.matmul %5, %6, %cst {dimension_numbers = #tpu.dot_dimension_numbers<[2], [1], [1], [2], [0, 0, 0, 1, 1, 2], [0], [0]>} : vector<4x8x128xbf16>, vector<4x128x32xbf16>, vector<4x8x32xf32> -> vector<4x8x32xf32>
    "tpu.trace_stop"() : () -> ()
    %c0_5 = arith.constant 0 : index
    %c0_6 = arith.constant 0 : index
    %c0_7 = arith.constant 0 : index
    %8 = vector.load %arg3[%c0_5, %c0_6, %c0_7] : memref<4x1x32xf32, #tpu.memory_space<vmem>>, vector<4x1x32xf32>
    %9 = vector.broadcast %8 : vector<4x1x32xf32> to vector<4x8x32xf32>
    %10 = arith.addf %7, %9 : vector<4x8x32xf32>
    %c0_8 = arith.constant 0 : index
    %c0_9 = arith.constant 0 : index
    %c0_10 = arith.constant 0 : index
    %11 = vector.load %arg4[%c0_8, %c0_9, %c0_10] : memref<4x128x32xbf16, #tpu.memory_space<vmem>>, vector<4x128x32xbf16>
    "tpu.trace_start"() <{level = 10 : i32, message = "hte,hed->htd"}> : () -> ()
    %cst_11 = arith.constant dense<0.000000e+00> : vector<4x8x32xf32>
    %12 = tpu.matmul %5, %11, %cst_11 {dimension_numbers = #tpu.dot_dimension_numbers<[2], [1], [1], [2], [0, 0, 0, 1, 1, 2], [0], [0]>} : vector<4x8x128xbf16>, vector<4x128x32xbf16>, vector<4x8x32xf32> -> vector<4x8x32xf32>
    "tpu.trace_stop"() : () -> ()
    %c0_12 = arith.constant 0 : index
    %c0_13 = arith.constant 0 : index
    %c0_14 = arith.constant 0 : index
    %13 = vector.load %arg5[%c0_12, %c0_13, %c0_14] : memref<4x1x32xf32, #tpu.memory_space<vmem>>, vector<4x1x32xf32>
    %14 = vector.broadcast %13 : vector<4x1x32xf32> to vector<4x8x32xf32>
    %15 = arith.addf %12, %14 : vector<4x8x32xf32>
    %c0_15 = arith.constant 0 : index
    %c0_16 = arith.constant 0 : index
    %c0_17 = arith.constant 0 : index
    %16 = vector.load %arg6[%c0_15, %c0_16, %c0_17] : memref<4x128x32xbf16, #tpu.memory_space<vmem>>, vector<4x128x32xbf16>
    "tpu.trace_start"() <{level = 10 : i32, message = "hte,hed->htd"}> : () -> ()
    %cst_18 = arith.constant dense<0.000000e+00> : vector<4x8x32xf32>
    %17 = tpu.matmul %5, %16, %cst_18 {dimension_numbers = #tpu.dot_dimension_numbers<[2], [1], [1], [2], [0, 0, 0, 1, 1, 2], [0], [0]>} : vector<4x8x128xbf16>, vector<4x128x32xbf16>, vector<4x8x32xf32> -> vector<4x8x32xf32>
    "tpu.trace_stop"() : () -> ()
    %c0_19 = arith.constant 0 : index
    %c0_20 = arith.constant 0 : index
    %c0_21 = arith.constant 0 : index
    %18 = vector.load %arg7[%c0_19, %c0_20, %c0_21] : memref<4x1x32xf32, #tpu.memory_space<vmem>>, vector<4x1x32xf32>
    %19 = vector.broadcast %18 : vector<4x1x32xf32> to vector<4x8x32xf32>
    %20 = arith.addf %17, %19 : vector<4x8x32xf32>
    %21 = arith.truncf %10 : vector<4x8x32xf32> to vector<4x8x32xbf16>
    %22 = arith.truncf %15 : vector<4x8x32xf32> to vector<4x8x32xbf16>
    "tpu.trace_start"() <{level = 10 : i32, message = "htd,hsd->hts"}> : () -> ()
    %cst_22 = arith.constant dense<0.000000e+00> : vector<4x8x8xf32>
    %23 = tpu.matmul %21, %22, %cst_22 {dimension_numbers = #tpu.dot_dimension_numbers<[2], [2], [1], [1], [0, 0, 0, 1, 1, 1], [0], [0]>} : vector<4x8x32xbf16>, vector<4x8x32xbf16>, vector<4x8x8xf32> -> vector<4x8x8xf32>
    "tpu.trace_stop"() : () -> ()
    %cst_23 = arith.constant 0.176776692 : f32
    %24 = vector.broadcast %cst_23 : f32 to vector<4x8x8xf32>
    %25 = arith.mulf %23, %24 : vector<4x8x8xf32>
    %cst_24 = arith.constant dense<0xFF800000> : vector<4x8xf32>
    %26 = vector.multi_reduction <maximumf>, %25, %cst_24 [2] : vector<4x8x8xf32> to vector<4x8xf32>
    %27 = vector.shape_cast %26 : vector<4x8xf32> to vector<4x8x1xf32>
    %28 = vector.broadcast %27 : vector<4x8x1xf32> to vector<4x8x8xf32>
    %29 = arith.subf %25, %28 : vector<4x8x8xf32>
    %30 = math.exp %29 : vector<4x8x8xf32>
    %cst_25 = arith.constant dense<0.000000e+00> : vector<4x8xf32>
    %31 = vector.multi_reduction <add>, %30, %cst_25 [2] : vector<4x8x8xf32> to vector<4x8xf32>
    %32 = vector.shape_cast %31 : vector<4x8xf32> to vector<4x8x1xf32>
    %33 = tpu.reciprocal %32 {approx = true} : vector<4x8x1xf32> -> vector<4x8x1xf32>
    %34 = vector.broadcast %33 : vector<4x8x1xf32> to vector<4x8x8xf32>
    %35 = arith.mulf %30, %34 : vector<4x8x8xf32>
    %36 = arith.truncf %35 : vector<4x8x8xf32> to vector<4x8x8xbf16>
    %37 = arith.truncf %20 : vector<4x8x32xf32> to vector<4x8x32xbf16>
    "tpu.trace_start"() <{level = 10 : i32, message = "hts,hsd->htd"}> : () -> ()
    %cst_26 = arith.constant dense<0.000000e+00> : vector<4x8x32xf32>
    %38 = tpu.matmul %36, %37, %cst_26 {dimension_numbers = #tpu.dot_dimension_numbers<[2], [1], [1], [2], [0, 0, 0, 1, 1, 2], [0], [0]>} : vector<4x8x8xbf16>, vector<4x8x32xbf16>, vector<4x8x32xf32> -> vector<4x8x32xf32>
    "tpu.trace_stop"() : () -> ()
    %39 = arith.truncf %38 : vector<4x8x32xf32> to vector<4x8x32xbf16>
    %c0_27 = arith.constant 0 : index
    %c0_28 = arith.constant 0 : index
    %c0_29 = arith.constant 0 : index
    %40 = vector.load %arg8[%c0_27, %c0_28, %c0_29] : memref<4x32x128xbf16, #tpu.memory_space<vmem>>, vector<4x32x128xbf16>
    "tpu.trace_start"() <{level = 10 : i32, message = "htd,hde->hte"}> : () -> ()
    %cst_30 = arith.constant dense<0.000000e+00> : vector<4x8x128xf32>
    %41 = tpu.matmul %39, %40, %cst_30 {dimension_numbers = #tpu.dot_dimension_numbers<[2], [1], [1], [2], [0, 0, 0, 1, 1, 2], [0], [0]>} : vector<4x8x32xbf16>, vector<4x32x128xbf16>, vector<4x8x128xf32> -> vector<4x8x128xf32>
    "tpu.trace_stop"() : () -> ()
    %cst_31 = arith.constant dense<0.000000e+00> : vector<8x128xf32>
    %42 = vector.multi_reduction <add>, %41, %cst_31 [0] : vector<4x8x128xf32> to vector<8x128xf32>
    %c0_32 = arith.constant 0 : index
    %c0_33 = arith.constant 0 : index
    %43 = vector.load %arg9[%c0_32, %c0_33] : memref<1x128xf32, #tpu.memory_space<vmem>>, vector<1x128xf32>
    %44 = vector.broadcast %43 : vector<1x128xf32> to vector<8x128xf32>
    %45 = arith.addf %42, %44 : vector<8x128xf32>
    %46 = arith.addf %1, %45 : vector<8x128xf32>
    %c0_34 = arith.constant 0 : index
    %c0_35 = arith.constant 0 : index
    %47 = vector.load %arg10[%c0_34, %c0_35] : memref<1x128xf32, #tpu.memory_space<vmem>>, vector<1x128xf32>
    %c0_36 = arith.constant 0 : index
    %c0_37 = arith.constant 0 : index
    %48 = vector.load %arg11[%c0_36, %c0_37] : memref<1x128xf32, #tpu.memory_space<vmem>>, vector<1x128xf32>
    %cst_38 = arith.constant dense<0.000000e+00> : vector<8xf32>
    %49 = vector.multi_reduction <add>, %46, %cst_38 [1] : vector<8x128xf32> to vector<8xf32>
    %50 = vector.shape_cast %49 : vector<8xf32> to vector<8x1xf32>
    %cst_39 = arith.constant 1.280000e+02 : f32
    %51 = vector.broadcast %cst_39 : f32 to vector<8x1xf32>
    %52 = arith.divf %50, %51 : vector<8x1xf32>
    %53 = vector.broadcast %52 : vector<8x1xf32> to vector<8x128xf32>
    %54 = arith.subf %46, %53 : vector<8x128xf32>
    %55 = arith.mulf %54, %54 : vector<8x128xf32>
    %cst_40 = arith.constant dense<0.000000e+00> : vector<8xf32>
    %56 = vector.multi_reduction <add>, %55, %cst_40 [1] : vector<8x128xf32> to vector<8xf32>
    %57 = vector.shape_cast %56 : vector<8xf32> to vector<8x1xf32>
    %cst_41 = arith.constant 1.280000e+02 : f32
    %58 = vector.broadcast %cst_41 : f32 to vector<8x1xf32>
    %59 = arith.divf %57, %58 : vector<8x1xf32>
    %60 = vector.broadcast %52 : vector<8x1xf32> to vector<8x128xf32>
    %61 = arith.subf %46, %60 : vector<8x128xf32>
    %cst_42 = arith.constant 9.99999974E-6 : f32
    %62 = vector.broadcast %cst_42 : f32 to vector<8x1xf32>
    %63 = arith.addf %59, %62 : vector<8x1xf32>
    %64 = math.rsqrt %63 : vector<8x1xf32>
    %65 = vector.broadcast %64 : vector<8x1xf32> to vector<8x128xf32>
    %66 = arith.mulf %61, %65 : vector<8x128xf32>
    %67 = vector.broadcast %47 : vector<1x128xf32> to vector<8x128xf32>
    %68 = arith.mulf %66, %67 : vector<8x128xf32>
    %69 = vector.broadcast %48 : vector<1x128xf32> to vector<8x128xf32>
    %70 = arith.addf %68, %69 : vector<8x128xf32>
    %71 = arith.truncf %70 : vector<8x128xf32> to vector<8x128xbf16>
    %c0_43 = arith.constant 0 : index
    %c0_44 = arith.constant 0 : index
    %72 = vector.load %arg12[%c0_43, %c0_44] : memref<128x256xbf16, #tpu.memory_space<vmem>>, vector<128x256xbf16>
    %cst_45 = arith.constant dense<0.000000e+00> : vector<8x256xf32>
    %73 = tpu.matmul %71, %72, %cst_45 {dimension_numbers = #tpu.dot_dimension_numbers<[1], [0], [0], [1], [0, 0, 1, 1], [], []>} : vector<8x128xbf16>, vector<128x256xbf16>, vector<8x256xf32> -> vector<8x256xf32>
    %c0_46 = arith.constant 0 : index
    %c0_47 = arith.constant 0 : index
    %74 = vector.load %arg13[%c0_46, %c0_47] : memref<1x256xf32, #tpu.memory_space<vmem>>, vector<1x256xf32>
    %75 = vector.broadcast %74 : vector<1x256xf32> to vector<8x256xf32>
    %76 = arith.addf %73, %75 : vector<8x256xf32>
    %cst_48 = arith.constant 0.000000e+00 : f32
    %77 = vector.broadcast %cst_48 : f32 to vector<8x256xf32>
    %78 = arith.maximumf %76, %77 : vector<8x256xf32>
    %79 = arith.truncf %78 : vector<8x256xf32> to vector<8x256xbf16>
    %c0_49 = arith.constant 0 : index
    %c0_50 = arith.constant 0 : index
    %80 = vector.load %arg14[%c0_49, %c0_50] : memref<256x128xbf16, #tpu.memory_space<vmem>>, vector<256x128xbf16>
    %cst_51 = arith.constant dense<0.000000e+00> : vector<8x128xf32>
    %81 = tpu.matmul %79, %80, %cst_51 {dimension_numbers = #tpu.dot_dimension_numbers<[1], [0], [0], [1], [0, 0, 1, 1], [], []>} : vector<8x256xbf16>, vector<256x128xbf16>, vector<8x128xf32> -> vector<8x128xf32>
    %c0_52 = arith.constant 0 : index
    %c0_53 = arith.constant 0 : index
    %82 = vector.load %arg15[%c0_52, %c0_53] : memref<1x128xf32, #tpu.memory_space<vmem>>, vector<1x128xf32>
    %83 = vector.broadcast %82 : vector<1x128xf32> to vector<8x128xf32>
    %84 = arith.addf %81, %83 : vector<8x128xf32>
    %85 = arith.addf %70, %84 : vector<8x128xf32>
    %c0_54 = arith.constant 0 : index
    %c0_55 = arith.constant 0 : index
    %86 = vector.load %arg16[%c0_54, %c0_55] : memref<1x128xf32, #tpu.memory_space<vmem>>, vector<1x128xf32>
    %c0_56 = arith.constant 0 : index
    %c0_57 = arith.constant 0 : index
    %87 = vector.load %arg17[%c0_56, %c0_57] : memref<1x128xf32, #tpu.memory_space<vmem>>, vector<1x128xf32>
    %cst_58 = arith.constant dense<0.000000e+00> : vector<8xf32>
    %88 = vector.multi_reduction <add>, %85, %cst_58 [1] : vector<8x128xf32> to vector<8xf32>
    %89 = vector.shape_cast %88 : vector<8xf32> to vector<8x1xf32>
    %cst_59 = arith.constant 1.280000e+02 : f32
    %90 = vector.broadcast %cst_59 : f32 to vector<8x1xf32>
    %91 = arith.divf %89, %90 : vector<8x1xf32>
    %92 = vector.broadcast %91 : vector<8x1xf32> to vector<8x128xf32>
    %93 = arith.subf %85, %92 : vector<8x128xf32>
    %94 = arith.mulf %93, %93 : vector<8x128xf32>
    %cst_60 = arith.constant dense<0.000000e+00> : vector<8xf32>
    %95 = vector.multi_reduction <add>, %94, %cst_60 [1] : vector<8x128xf32> to vector<8xf32>
    %96 = vector.shape_cast %95 : vector<8xf32> to vector<8x1xf32>
    %cst_61 = arith.constant 1.280000e+02 : f32
    %97 = vector.broadcast %cst_61 : f32 to vector<8x1xf32>
    %98 = arith.divf %96, %97 : vector<8x1xf32>
    %99 = vector.broadcast %91 : vector<8x1xf32> to vector<8x128xf32>
    %100 = arith.subf %85, %99 : vector<8x128xf32>
    %cst_62 = arith.constant 9.99999974E-6 : f32
    %101 = vector.broadcast %cst_62 : f32 to vector<8x1xf32>
    %102 = arith.addf %98, %101 : vector<8x1xf32>
    %103 = math.rsqrt %102 : vector<8x1xf32>
    %104 = vector.broadcast %103 : vector<8x1xf32> to vector<8x128xf32>
    %105 = arith.mulf %100, %104 : vector<8x128xf32>
    %106 = vector.broadcast %86 : vector<1x128xf32> to vector<8x128xf32>
    %107 = arith.mulf %105, %106 : vector<8x128xf32>
    %108 = vector.broadcast %87 : vector<1x128xf32> to vector<8x128xf32>
    %109 = arith.addf %107, %108 : vector<8x128xf32>
    %c0_63 = arith.constant 0 : index
    %c0_64 = arith.constant 0 : index
    %c0_65 = arith.constant 0 : index
    %110 = vector.load %arg18[%c0_63, %c0_64, %c0_65] : memref<1x8x128xf32, #tpu.memory_space<vmem>>, vector<1x8x128xf32>
    %111 = vector.shape_cast %110 : vector<1x8x128xf32> to vector<8x128xf32>
    %112 = vector.shape_cast %109 : vector<8x128xf32> to vector<1x8x128xf32>
    tpu.vector_store %arg18[%c0_63, %c0_64, %c0_65], %112 {strides = array<i32>} : memref<1x8x128xf32, #tpu.memory_space<vmem>>, vector<1x8x128xf32>,
    return
  }
  func.func @transform_0(%arg0: i32) -> (i32, i32, i32) {
    %c0_i32 = arith.constant 0 : i32
    %c0_i32_0 = arith.constant 0 : i32
    %c0_i32_1 = arith.constant 0 : i32
    return %arg0, %c0_i32, %c0_i32_0 : i32, i32, i32
  }
  func.func @transform_1(%arg0: i32) -> (i32, i32, i32) {
    %c0_i32 = arith.constant 0 : i32
    %c0_i32_0 = arith.constant 0 : i32
    %c0_i32_1 = arith.constant 0 : i32
    %c0_i32_2 = arith.constant 0 : i32
    return %c0_i32, %c0_i32_0, %c0_i32_1 : i32, i32, i32
  }
  func.func @transform_2(%arg0: i32) -> (i32, i32, i32) {
    %c0_i32 = arith.constant 0 : i32
    %c0_i32_0 = arith.constant 0 : i32
    %c0_i32_1 = arith.constant 0 : i32
    %c0_i32_2 = arith.constant 0 : i32
    return %c0_i32, %c0_i32_0, %c0_i32_1 : i32, i32, i32
  }
  func.func @transform_3(%arg0: i32) -> (i32, i32, i32) {
    %c0_i32 = arith.constant 0 : i32
    %c0_i32_0 = arith.constant 0 : i32
    %c0_i32_1 = arith.constant 0 : i32
    %c0_i32_2 = arith.constant 0 : i32
    return %c0_i32, %c0_i32_0, %c0_i32_1 : i32, i32, i32
  }
  func.func @transform_4(%arg0: i32) -> (i32, i32, i32) {
    %c0_i32 = arith.constant 0 : i32
    %c0_i32_0 = arith.constant 0 : i32
    %c0_i32_1 = arith.constant 0 : i32
    %c0_i32_2 = arith.constant 0 : i32
    return %c0_i32, %c0_i32_0, %c0_i32_1 : i32, i32, i32
  }
  func.func @transform_5(%arg0: i32) -> (i32, i32, i32) {
    %c0_i32 = arith.constant 0 : i32
    %c0_i32_0 = arith.constant 0 : i32
    %c0_i32_1 = arith.constant 0 : i32
    %c0_i32_2 = arith.constant 0 : i32
    return %c0_i32, %c0_i32_0, %c0_i32_1 : i32, i32, i32
  }
  func.func @transform_6(%arg0: i32) -> (i32, i32, i32) {
    %c0_i32 = arith.constant 0 : i32
    %c0_i32_0 = arith.constant 0 : i32
    %c0_i32_1 = arith.constant 0 : i32
    %c0_i32_2 = arith.constant 0 : i32
    return %c0_i32, %c0_i32_0, %c0_i32_1 : i32, i32, i32
  }
  func.func @transform_7(%arg0: i32) -> (i32, i32, i32) {
    %c0_i32 = arith.constant 0 : i32
    %c0_i32_0 = arith.constant 0 : i32
    %c0_i32_1 = arith.constant 0 : i32
    %c0_i32_2 = arith.constant 0 : i32
    return %c0_i32, %c0_i32_0, %c0_i32_1 : i32, i32, i32
  }
  func.func @transform_8(%arg0: i32) -> (i32, i32) {
    %c0_i32 = arith.constant 0 : i32
    %c0_i32_0 = arith.constant 0 : i32
    %c0_i32_1 = arith.constant 0 : i32
    return %c0_i32, %c0_i32_0 : i32, i32
  }
  func.func @transform_9(%arg0: i32) -> (i32, i32) {
    %c0_i32 = arith.constant 0 : i32
    %c0_i32_0 = arith.constant 0 : i32
    %c0_i32_1 = arith.constant 0 : i32
    return %c0_i32, %c0_i32_0 : i32, i32
  }
  func.func @transform_10(%arg0: i32) -> (i32, i32) {
    %c0_i32 = arith.constant 0 : i32
    %c0_i32_0 = arith.constant 0 : i32
    %c0_i32_1 = arith.constant 0 : i32
    return %c0_i32, %c0_i32_0 : i32, i32
  }
  func.func @transform_11(%arg0: i32) -> (i32, i32) {
    %c0_i32 = arith.constant 0 : i32
    %c0_i32_0 = arith.constant 0 : i32
    %c0_i32_1 = arith.constant 0 : i32
    return %c0_i32, %c0_i32_0 : i32, i32
  }
  func.func @transform_12(%arg0: i32) -> (i32, i32) {
    %c0_i32 = arith.constant 0 : i32
    %c0_i32_0 = arith.constant 0 : i32
    %c0_i32_1 = arith.constant 0 : i32
    return %c0_i32, %c0_i32_0 : i32, i32
  }
  func.func @transform_13(%arg0: i32) -> (i32, i32) {
    %c0_i32 = arith.constant 0 : i32
    %c0_i32_0 = arith.constant 0 : i32
    %c0_i32_1 = arith.constant 0 : i32
    return %c0_i32, %c0_i32_0 : i32, i32
  }
  func.func @transform_14(%arg0: i32) -> (i32, i32) {
    %c0_i32 = arith.constant 0 : i32
    %c0_i32_0 = arith.constant 0 : i32
    %c0_i32_1 = arith.constant 0 : i32
    return %c0_i32, %c0_i32_0 : i32, i32
  }
  func.func @transform_15(%arg0: i32) -> (i32, i32) {
    %c0_i32 = arith.constant 0 : i32
    %c0_i32_0 = arith.constant 0 : i32
    %c0_i32_1 = arith.constant 0 : i32
    return %c0_i32, %c0_i32_0 : i32, i32
  }
  func.func @transform_16(%arg0: i32) -> (i32, i32) {
    %c0_i32 = arith.constant 0 : i32
    %c0_i32_0 = arith.constant 0 : i32
    %c0_i32_1 = arith.constant 0 : i32
    return %c0_i32, %c0_i32_0 : i32, i32
  }
  func.func @transform_17(%arg0: i32) -> (i32, i32, i32) {
    %c0_i32 = arith.constant 0 : i32
    %c0_i32_0 = arith.constant 0 : i32
    %c0_i32_1 = arith.constant 0 : i32
    return %arg0, %c0_i32, %c0_i32_0 : i32, i32, i32
  }
}

module attributes {stable_mosaic.version = 11 : i64} {
  func.func @_head_kernel(%arg0: i32, %arg1: memref<1x8x128xf32, #tpu.memory_space<vmem>>, %arg2: memref<128x8xbf16, #tpu.memory_space<vmem>>, %arg3: memref<1x8xf32, #tpu.memory_space<vmem>>, %arg4: memref<1x8x8xf32, #tpu.memory_space<vmem>>) attributes {dimension_semantics = [#tpu.dimension_semantics<parallel>], iteration_bounds = array<i64: 2>, scalar_prefetch = 0 : i64, scratch_operands = 0 : i64, tpu.core_type = #tpu.core_type<tc>, window_params = [{transform_indices = @transform_0, window_bounds = array<i64: 1, 8, 128>}, {pipeline_mode = #tpu.pipeline_mode<synchronous>, transform_indices = @transform_1, window_bounds = array<i64: 128, 8>}, {pipeline_mode = #tpu.pipeline_mode<synchronous>, transform_indices = @transform_2, window_bounds = array<i64: 1, 8>}, {transform_indices = @transform_3, window_bounds = array<i64: 1, 8, 8>}]} {
    %c0 = arith.constant 0 : index
    %c0_0 = arith.constant 0 : index
    %c0_1 = arith.constant 0 : index
    %0 = vector.load %arg1[%c0, %c0_0, %c0_1] : memref<1x8x128xf32, #tpu.memory_space<vmem>>, vector<1x8x128xf32>
    %1 = vector.shape_cast %0 : vector<1x8x128xf32> to vector<8x128xf32>
    %2 = arith.truncf %1 : vector<8x128xf32> to vector<8x128xbf16>
    %c0_2 = arith.constant 0 : index
    %c0_3 = arith.constant 0 : index
    %3 = vector.load %arg2[%c0_2, %c0_3] : memref<128x8xbf16, #tpu.memory_space<vmem>>, vector<128x8xbf16>
    %cst = arith.constant dense<0.000000e+00> : vector<8x8xf32>
    %4 = tpu.matmul %2, %3, %cst {dimension_numbers = #tpu.dot_dimension_numbers<[1], [0], [0], [1], [0, 0, 1, 1], [], []>} : vector<8x128xbf16>, vector<128x8xbf16>, vector<8x8xf32> -> vector<8x8xf32>
    %c0_4 = arith.constant 0 : index
    %c0_5 = arith.constant 0 : index
    %5 = vector.load %arg3[%c0_4, %c0_5] : memref<1x8xf32, #tpu.memory_space<vmem>>, vector<1x8xf32>
    %6 = vector.broadcast %5 : vector<1x8xf32> to vector<8x8xf32>
    %7 = arith.addf %4, %6 : vector<8x8xf32>
    %c0_6 = arith.constant 0 : index
    %c0_7 = arith.constant 0 : index
    %c0_8 = arith.constant 0 : index
    %8 = vector.load %arg4[%c0_6, %c0_7, %c0_8] : memref<1x8x8xf32, #tpu.memory_space<vmem>>, vector<1x8x8xf32>
    %9 = vector.shape_cast %8 : vector<1x8x8xf32> to vector<8x8xf32>
    %10 = vector.shape_cast %7 : vector<8x8xf32> to vector<1x8x8xf32>
    tpu.vector_store %arg4[%c0_6, %c0_7, %c0_8], %10 {strides = array<i32>} : memref<1x8x8xf32, #tpu.memory_space<vmem>>, vector<1x8x8xf32>,
    return
  }
  func.func @transform_0(%arg0: i32) -> (i32, i32, i32) {
    %c0_i32 = arith.constant 0 : i32
    %c0_i32_0 = arith.constant 0 : i32
    %c0_i32_1 = arith.constant 0 : i32
    return %arg0, %c0_i32, %c0_i32_0 : i32, i32, i32
  }
  func.func @transform_1(%arg0: i32) -> (i32, i32) {
    %c0_i32 = arith.constant 0 : i32
    %c0_i32_0 = arith.constant 0 : i32
    %c0_i32_1 = arith.constant 0 : i32
    return %c0_i32, %c0_i32_0 : i32, i32
  }
  func.func @transform_2(%arg0: i32) -> (i32, i32) {
    %c0_i32 = arith.constant 0 : i32
    %c0_i32_0 = arith.constant 0 : i32
    %c0_i32_1 = arith.constant 0 : i32
    return %c0_i32, %c0_i32_0 : i32, i32
  }
  func.func @transform_3(%arg0: i32) -> (i32, i32, i32) {
    %c0_i32 = arith.constant 0 : i32
    %c0_i32_0 = arith.constant 0 : i32
    %c0_i32_1 = arith.constant 0 : i32
    return %arg0, %c0_i32, %c0_i32_0 : i32, i32, i32
  }
}

</mosaic_0001>

<bundles_post_ra>
// kernel: transformer_encoder_forward.4
= control target key start
LH: loop header
LB: loop body
LE: loop exit
PB: predicated region body
PF: predicated region fallthrough
CT: control target
= control target key end

     0   :  { %s377_s15 = smov 0   ;;  %s403_s0 = inlined_call_operand.vmem [shape: f32[2,8,16], index: 0, kind: input, shape index: {}]   ;;  %s404_s1 = inlined_call_operand.vmem [shape: bf16[16,128], index: 1, kind: input, shape index: {}]   ;;  %s405_s2 = inlined_call_operand.vmem [shape: f32[1,128], index: 2, kind: input, shape index: {}]   ;;  %s406_s3 = inlined_call_operand.vmem [shape: f32[8,128], index: 3, kind: input, shape index: {}]   ;;  %s407_s4 = inlined_call_operand.vmem [shape: f32[2,8,128], index: 4, kind: output, shape index: {}]  }
   0x1 LB: > { %s311_s16 = sadd.s32 4294967295, %s348_s15   ;;  %p315_p0 = scmp.ge.s32.totalorder %s348_s15, 1  ;;  %s348_s15 = sphi %s377_s15, %s14_s15  }
   0x2   : > { %p161_p1 = scmp.lt.s32.totalorder %s348_s15, 3 }
   0x4   : > { %p162_p2 = pnand %p315_p0, %p161_p1 }
   0x5   : > { %p185_p3 = scmp.lt.s32.totalorder (!%p162_p2), %s311_s16, 1 }
   0x6   : > { %165 = sbr.rel (%p162_p2) target bundleno = 216 (0xd8), region = 36 }
   0xb   : > { %v341_v0 = vld [vmem:[%s404_s1] sm:$0xff]   ;;  %v350_v1 = vmov 0.0   ;;  %vm351_vm0 = vmmov 0   ;;  %s409_s16 = smov (!%p185_p3, %s311_s16), 1  ;;  %vm211_vm1 = vcmask 130048  }
   0xc   : > { %325 = vmatprep.subr.bf16.mxu0 %v350_v1  ;;  %327 = vmatprep.mubr.msk.bf16.mxu0 %vm351_vm0, %v350_v1  ;;  %s316_s19 = sshll.u32 %s409_s16, 3  ;;  %v318_v4 = vld [vmem:[%s405_s2] ss:$0 sm:$0xff] }
   0xd   : > { %326 = vmatpush3.bf16.msra.mxu0 %v341_v0  ;;  %s188_s22 = scalar_lea.vmem %s403_s0, %s316_s19  ;;  %v255_v6 = vld [vmem:[%s406_s3] sm:$0xff]  ;;  %s192_s29 = scalar_lea.vmem %s407_s4, %s316_s19 }
   0xe   : > { %v194_v2 = vld [vmem:[%s188_s22] sm:$0xff] }
   0xf   : > { %v195_v3 = vpack.c.bf16 %v194_v2, %v194_v2 }
  0x11   : > { %328 = vmatmul.mubr.msk.bf16.vlgmr.msra.gmra.mxu0 %vm211_vm1, %v195_v3 }
  0xd1   : > { %v249_v5 = vpop.f32.mrf.mxu0 }
  0xd2   : > { %v250_v7 = vadd.f32 %v318_v4, %v249_v5 }
  0xd3   : > { %v329_v8 = vpop.f32.mrf.mxu0 }
  0xd4   : > { %v256_v9 = vadd.f32 %v255_v6, %v250_v7 }
  0xd5   : > { %v252_v10 = vpop.f32.mrf.mxu0 }
  0xd6   : > { %257 = vst [vmem:[%s192_s29] sm:$0xff] %v256_v9 }
  0xd7   : > { %v330_v11 = vpop.f32.mrf.mxu0 }
  0xd8 PF: > { %s14_s15 = sadd.s32 1, %s348_s15  }
  0xd9   : > { %p11_p4 = scmp.ge.s32.totalorder %s14_s15, 4  }
  0xdb   :  { %13 = sbr.rel (!%p11_p4) target bundleno = 1 (0x1), region = 66 }

// kernel: transformer_encoder_forward.7
= control target key start
LH: loop header
LB: loop body
LE: loop exit
PB: predicated region body
PF: predicated region fallthrough
CT: control target
= control target key end

     0   :  { %s430_s12 = smov 0   ;;  %s474_s0 = inlined_call_operand.vmem [shape: f32[2,8,128], index: 0, kind: input, shape index: {}]   ;;  %s475_s1 = inlined_call_operand.vmem [shape: bf16[128,8], index: 1, kind: input, shape index: {}]   ;;  %s476_s2 = inlined_call_operand.vmem [shape: f32[1,8], index: 2, kind: input, shape index: {}]   ;;  %s477_s3 = inlined_call_operand.vmem [shape: f32[2,8,8], index: 3, kind: output, shape index: {}]  }
   0x1 LB: > { %s335_s13 = sadd.s32 4294967295, %s406_s12   ;;  %p339_p0 = scmp.ge.s32.totalorder %s406_s12, 1  ;;  %s406_s12 = sphi %s430_s12, %s13_s12  }
   0x2   : > { %p136_p1 = scmp.lt.s32.totalorder %s406_s12, 3 }
   0x4   : > { %p137_p2 = pnand %p339_p0, %p136_p1 }
   0x5   : > { %p158_p3 = scmp.lt.s32.totalorder (!%p137_p2), %s335_s13, 1 }
   0x6   : > { %140 = sbr.rel (%p137_p2) target bundleno = 243 (0xf3), region = 32 }
   0xb   : > { %v392_v0 = vld [vmem:[%s475_s1 + $0x38] sm:$0xff]   ;;  %v408_v1 = vmov 0.0   ;;  %v393_v2 = vld [vmem:[%s475_s1 + $0x30] sm:$0xff]   ;;  %vm409_vm0 = vmmov 0   ;;  %v394_v3 = vld [vmem:[%s475_s1 + $0x28] sm:$0xff]   ;;  %s479_s13 = smov (!%p158_p3, %s335_s13), 1 }
   0xc   : > { %362 = vmatprep.subr.bf16.mxu0 %v408_v1  ;;  %378 = vmatprep.mubr.msk.bf16.mxu0 %vm409_vm0, %v408_v1  ;;  %v395_v4 = vld [vmem:[%s475_s1 + $0x20] sm:$0xff]   ;;  %v396_v5 = vld [vmem:[%s475_s1 + $0x18] sm:$0xff]   ;;  %v397_v6 = vld [vmem:[%s475_s1 + $0x10] sm:$0xff]   ;;  %s340_s26 = sshll.u32 %s479_s13, 3  ;;  %vm280_vm1 = vcmask 64512  }
   0xd   : > { %363 = vmatpush3.bf16.msra.mxu0 %v392_v0  ;;  %v398_v7 = vld [vmem:[%s475_s1 + $0x8] sm:$0xff]   ;;  %s161_s4 = scalar_lea.vmem %s474_s0, %s340_s26  ;;  %v399_v8 = vld [vmem:[%s475_s1] sm:$0xff]   ;;  %s165_s11 = scalar_lea.vmem %s477_s3, %s340_s26 }
   0xe   : > { %364 = vmatprep.subr.bf16.mxu0 %v408_v1  ;;  %v167_v9 = vld [vmem:[%s161_s4] sm:$0xff] }
   0xf   : > { %v168_v10 = vpack.c.bf16 %v167_v9, %v167_v9  ;;  %v342_v11 = vld [vmem:[%s476_s2] ss:$0 sm:$0xff] }
  0x11   : > { %365 = vmatpush3.bf16.msra.mxu0 %v393_v2 }
  0x12   : > { %366 = vmatprep.subr.bf16.mxu0 %v408_v1 }
  0x15   : > { %367 = vmatpush3.bf16.msra.mxu0 %v394_v3 }
  0x16   : > { %368 = vmatprep.subr.bf16.mxu0 %v408_v1 }
  0x19   : > { %369 = vmatpush3.bf16.msra.mxu0 %v395_v4 }
  0x1a   : > { %370 = vmatprep.subr.bf16.mxu0 %v408_v1 }
  0x1d   : > { %371 = vmatpush3.bf16.msra.mxu0 %v396_v5 }
  0x1e   : > { %372 = vmatprep.subr.bf16.mxu0 %v408_v1 }
  0x21   : > { %373 = vmatpush3.bf16.msra.mxu0 %v397_v6 }
  0x22   : > { %374 = vmatprep.subr.bf16.mxu0 %v408_v1 }
  0x25   : > { %375 = vmatpush3.bf16.msra.mxu0 %v398_v7 }
  0x26   : > { %376 = vmatprep.subr.bf16.mxu0 %v408_v1 }
  0x29   : > { %377 = vmatpush3.bf16.msra.mxu0 %v399_v8 }
  0x2c   : > { %379 = vmatmul.mubr.bf16.vlgmr.msra.gmra.mxu0 %v168_v10 }
  0xec   : > { %v274_v12 = vpop.f32.mrf.mxu0 }
  0xed   : > { %v275_v13 = vadd.f32 %v342_v11, %v274_v12 }
  0xee   : > { %v380_v14 = vpop.f32.mrf.mxu0 }
  0xef   : > { %281 = vst.msk [vmem:[%s165_s11] sm:$0xff] %vm280_vm1, %v275_v13 }
  0xf0   : > { %v277_v15 = vpop.f32.mrf.mxu0 }
  0xf2   : > { %v381_v16 = vpop.f32.mrf.mxu0 }
  0xf3 PF: > { %s13_s12 = sadd.s32 1, %s406_s12  }
  0xf4   : > { %p10_p4 = scmp.ge.s32.totalorder %s13_s12, 4  }
  0xf6   :  { %12 = sbr.rel (!%p10_p4) target bundleno = 1 (0x1), region = 62 }

// kernel: transformer_encoder_forward.5
= control target key start
LH: loop header
LB: loop body
LE: loop exit
PB: predicated region body
PF: predicated region fallthrough
CT: control target
= control target key end

     0   :  { %s3935_s24 = smov 0   ;;  %s4640_s0 = inlined_call_operand.vmem [shape: f32[2,8,128], index: 0, kind: input, shape index: {}]   ;;  %s4641_s1 = inlined_call_operand.vmem [shape: bf16[4,128,32], index: 1, kind: input, shape index: {}]   ;;  %s4642_s2 = inlined_call_operand.vmem [shape: f32[4,1,32], index: 2, kind: input, shape index: {}]   ;;  %s4643_s3 = inlined_call_operand.vmem [shape: bf16[4,128,32], index: 3, kind: input, shape index: {}]   ;;  %s4644_s4 = inlined_call_operand.vmem [shape: f32[4,1,32], index: 4, kind: input, shape index: {}]   ;;  %s4645_s5 = inlined_call_operand.vmem [shape: bf16[4,128,32], index: 5, kind: input, shape index: {}]   ;;  %s4646_s6 = inlined_call_operand.vmem [shape: f32[4,1,32], index: 6, kind: input, shape index: {}]   ;;  %s4647_s7 = inlined_call_operand.vmem [shape: bf16[4,32,128], index: 7, kind: input, shape index: {}]   ;;  %s4648_s8 = inlined_call_operand.vmem [shape: f32[1,128], index: 8, kind: input, shape index: {}]   ;;  %s4649_s9 = inlined_call_operand.vmem [shape: f32[1,128], index: 9, kind: input, shape index: {}]   ;;  %s4650_s10 = inlined_call_operand.vmem [shape: f32[1,128], index: 10, kind: input, shape index: {}]   ;;  %s4651_s11 = inlined_call_operand.vmem [shape: bf16[128,256], index: 11, kind: input, shape index: {}]   ;;  %s4652_s12 = inlined_call_operand.vmem [shape: f32[1,256], index: 12, kind: input, shape index: {}]   ;;  %s4653_s13 = inlined_call_operand.vmem [shape: bf16[256,128], index: 13, kind: input, shape index: {}]   ;;  %s4654_s14 = inlined_call_operand.vmem [shape: f32[1,128], index: 14, kind: input, shape index: {}]   ;;  %s4655_s15 = inlined_call_operand.vmem [shape: f32[1,128], index: 15, kind: input, shape index: {}]   ;;  %s4656_s16 = inlined_call_operand.vmem [shape: f32[1,128], index: 16, kind: input, shape index: {}]   ;;  %s4657_s17 = inlined_call_operand.vmem [shape: f32[2,8,128], index: 17, kind: output, shape index: {}]  }
   0x1   :  { %4659 = sst [smem:[#allocation2_spill]] %s4640_s0 }
   0x2   :  { %4660 = sst [smem:[#allocation3_spill]] %s4641_s1 }
   0x3 LB: > { %s3005_s25 = sadd.s32 4294967295, %s3840_s24   ;;  %p3009_p0 = scmp.ge.s32.totalorder %s3840_s24, 1  ;;  %s3840_s24 = sphi %s3935_s24, %s27_s24  }
   0x4   : > { %p486_p1 = scmp.lt.s32.totalorder %s3840_s24, 3 }
   0x6   : > { %p487_p2 = pnand %p3009_p0, %p486_p1 }
   0x7   : > { %s4661_s28 = sld [smem:[#allocation3_spill]] (!%p487_p2)  ;;  %p536_p3 = scmp.lt.s32.totalorder (!%p487_p2), %s3005_s25, 1 }
   0x8   : > { %490 = sbr.rel (%p487_p2) target bundleno = 2272 (0x8e0), region = 88  ;;  %s4662_s1 = sld [smem:[#allocation2_spill]] (!%p487_p2) }
   0xd   : > { %v3669_v0 = vld [vmem:[%s4661_s28 + $0x38] sm:$0xff]   ;;  %v3842_v1 = vmov 0.0   ;;  %v3671_v3 = vld [vmem:[%s4661_s28 + $0x30] sm:$0xff]   ;;  %vm3843_vm0 = vmmov 0   ;;  %v3673_v5 = vld [vmem:[%s4661_s28 + $0x28] sm:$0xff]   ;;  %s4664_s25 = smov (!%p536_p3, %s3005_s25), 1 }
   0xe   : > { %3338 = vmatprep.subr.bf16.mxu0 %v3842_v1  ;;  %3358 = vmatprep.subr.bf16.mxu1 %v3842_v1  ;;  %v3670_v2 = vld [vmem:[%s4661_s28 + $0x78] sm:$0xff]   ;;  %v3672_v4 = vld [vmem:[%s4661_s28 + $0x70] sm:$0xff]   ;;  %v3674_v6 = vld [vmem:[%s4661_s28 + $0x68] sm:$0xff]   ;;  %s3010_s26 = sshll.u32 %s4664_s25, 3  ;;  %vm1887_vm1 = vcmask 261120   ;;  %vm2132_vm2 = vcmask 1043456  }
   0xf   : > { %3339 = vmatpush3.bf16.msra.mxu0 %v3669_v0  ;;  %3354 = vmatprep.mubr.msk.bf16.mxu0 %vm3843_vm0, %v3842_v1  ;;  %v3675_v7 = vld [vmem:[%s4661_s28 + $0x20] sm:$0xff]   ;;  %v3677_v9 = vld [vmem:[%s4661_s28 + $0x18] sm:$0xff]   ;;  %v3679_v11 = vld [vmem:[%s4661_s28 + $0x10] sm:$0xff]   ;;  %s4014_s20 = scalar_lea.vmem %s4662_s1, %s3010_s26  ;;  %vm2076_vm3 = vcmask 64512   ;;  %s543_s18 = scalar_lea.vmem %s4657_s17, %s3010_s26 }
  0x10   : > { %3359 = vmatpush3.bf16.msra.mxu1 %v3670_v2  ;;  %3340 = vmatprep.subr.bf16.mxu0 %v3842_v1  ;;  %v3676_v8 = vld [vmem:[%s4661_s28 + $0x60] sm:$0xff]   ;;  %v3678_v10 = vld [vmem:[%s4661_s28 + $0x58] sm:$0xff]   ;;  %v3680_v12 = vld [vmem:[%s4661_s28 + $0x50] sm:$0xff]  }
  0x11   : > { %3360 = vmatprep.subr.bf16.mxu1 %v3842_v1  ;;  %3374 = vmatprep.mubr.msk.bf16.mxu1 %vm3843_vm0, %v3842_v1  ;;  %v3681_v13 = vld [vmem:[%s4661_s28 + $0x8] sm:$0xff]   ;;  %v3683_v15 = vld [vmem:[%s4661_s28] sm:$0xff]   ;;  %v3685_v19 = vld [vmem:[%s4661_s28 + $0xb8] sm:$0xff]  }
  0x12   : > { %v3682_v14 = vld [vmem:[%s4661_s28 + $0x48] sm:$0xff]   ;;  %v545_v16 = vld [vmem:[%s4014_s20] sm:$0xff]  ;;  %v3686_v20 = vld [vmem:[%s4661_s28 + $0xf8] sm:$0xff]  }
  0x13   : > { %3341 = vmatpush3.bf16.msra.mxu0 %v3671_v3  ;;  %v3684_v17 = vld [vmem:[%s4661_s28 + $0x40] sm:$0xff]   ;;  %v4026_v18 = vpack.c.bf16 %v545_v16, %v545_v16  ;;  %v3687_v21 = vld [vmem:[%s4661_s28 + $0xb0] sm:$0xff]   ;;  %v3689_v23 = vld [vmem:[%s4661_s28 + $0xa8] sm:$0xff]  }
  0x14   : > { %3361 = vmatpush3.bf16.msra.mxu1 %v3672_v4  ;;  %3342 = vmatprep.subr.bf16.mxu0 %v3842_v1  ;;  %v3688_v22 = vld [vmem:[%s4661_s28 + $0xf0] sm:$0xff]   ;;  %v3690_v24 = vld [vmem:[%s4661_s28 + $0xe8] sm:$0xff]   ;;  %v3691_v25 = vld [vmem:[%s4661_s28 + $0xa0] sm:$0xff]  }
  0x15   : > { %3362 = vmatprep.subr.bf16.mxu1 %v3842_v1  ;;  %v3692_v26 = vld [vmem:[%s4661_s28 + $0xe0] sm:$0xff]   ;;  %v3693_v27 = vld [vmem:[%s4661_s28 + $0x98] sm:$0xff]   ;;  %v3695_v29 = vld [vmem:[%s4661_s28 + $0x90] sm:$0xff]  }
  0x16   : > { %v3694_v28 = vld [vmem:[%s4661_s28 + $0xd8] sm:$0xff]   ;;  %v3696_v30 = vld [vmem:[%s4661_s28 + $0xd0] sm:$0xff]   ;;  %v3697_v31 = vld [vmem:[%s4661_s28 + $0x88] sm:$0xff]  }
  0x17   : > { %3343 = vmatpush3.bf16.msra.mxu0 %v3673_v5  ;;  %v3698_v32 = vld [vmem:[%s4661_s28 + $0xc8] sm:$0xff]   ;;  %v3699_v33 = vld [vmem:[%s4661_s28 + $0x80] sm:$0xff]   ;;  %v3701_v35 = vld [vmem:[%s4643_s3 + $0x38] sm:$0xff]  }
  0x18   : > { %3363 = vmatpush3.bf16.msra.mxu1 %v3674_v6  ;;  %3344 = vmatprep.subr.bf16.mxu0 %v3842_v1  ;;  %v3700_v34 = vld [vmem:[%s4661_s28 + $0xc0] sm:$0xff]   ;;  %v3702_v36 = vld [vmem:[%s4643_s3 + $0x78] sm:$0xff]   ;;  %v3703_v37 = vld [vmem:[%s4643_s3 + $0x30] sm:$0xff]  }
  0x19   : > { %3364 = vmatprep.subr.bf16.mxu1 %v3842_v1  ;;  %v3704_v38 = vld [vmem:[%s4643_s3 + $0x70] sm:$0xff]   ;;  %v3705_v39 = vld [vmem:[%s4643_s3 + $0x28] sm:$0xff]   ;;  %v3707_v41 = vld [vmem:[%s4643_s3 + $0x20] sm:$0xff]  }
  0x1a   : > { %v3706_v40 = vld [vmem:[%s4643_s3 + $0x68] sm:$0xff]   ;;  %v3708_v42 = vld [vmem:[%s4643_s3 + $0x60] sm:$0xff]   ;;  %v3709_v43 = vld [vmem:[%s4643_s3 + $0x18] sm:$0xff]  }
  0x1b   : > { %3345 = vmatpush3.bf16.msra.mxu0 %v3675_v7  ;;  %v3710_v44 = vld [vmem:[%s4643_s3 + $0x58] sm:$0xff]   ;;  %v3711_v45 = vld [vmem:[%s4643_s3 + $0x10] sm:$0xff]   ;;  %v3713_v47 = vld [vmem:[%s4643_s3 + $0x8] sm:$0xff]  }
  0x1c   : > { %3365 = vmatpush3.bf16.msra.mxu1 %v3676_v8  ;;  %3346 = vmatprep.subr.bf16.mxu0 %v3842_v1  ;;  %v3712_v46 = vld [vmem:[%s4643_s3 + $0x50] sm:$0xff]   ;;  %v3714_v48 = vld [vmem:[%s4643_s3 + $0x48] sm:$0xff]   ;;  %v3715_v49 = vld [vmem:[%s4643_s3] sm:$0xff]  }
  0x1d   : > { %3366 = vmatprep.subr.bf16.mxu1 %v3842_v1  ;;  %v3716_v50 = vld [vmem:[%s4643_s3 + $0x40] sm:$0xff]   ;;  %v3717_v51 = vld [vmem:[%s4643_s3 + $0xb8] sm:$0xff]   ;;  %v3719_v53 = vld [vmem:[%s4643_s3 + $0xb0] sm:$0xff]  }
  0x1e   : > { %v3718_v52 = vld [vmem:[%s4643_s3 + $0xf8] sm:$0xff]   ;;  %v3720_v54 = vld [vmem:[%s4643_s3 + $0xf0] sm:$0xff]   ;;  %v3721_v55 = vld [vmem:[%s4643_s3 + $0xa8] sm:$0xff]  }
  0x1f   : > { %3347 = vmatpush3.bf16.msra.mxu0 %v3677_v9  ;;  %v3722_v56 = vld [vmem:[%s4643_s3 + $0xe8] sm:$0xff]   ;;  %v3723_v57 = vld [vmem:[%s4643_s3 + $0xa0] sm:$0xff]   ;;  %v3725_v59 = vld [vmem:[%s4643_s3 + $0x98] sm:$0xff]  }
  0x20   : > { %3367 = vmatpush3.bf16.msra.mxu1 %v3678_v10  ;;  %3348 = vmatprep.subr.bf16.mxu0 %v3842_v1  ;;  %v3724_v58 = vld [vmem:[%s4643_s3 + $0xe0] sm:$0xff]   ;;  %v3726_v60 = vld [vmem:[%s4643_s3 + $0xd8] sm:$0xff]   ;;  %v3727_v61 = vld [vmem:[%s4643_s3 + $0x90] sm:$0xff]  }
  0x21   : > { %3368 = vmatprep.subr.bf16.mxu1 %v3842_v1  ;;  %v3728_v62 = vld [vmem:[%s4643_s3 + $0xd0] sm:$0xff]   ;;  %v3729_v63 = vld [vmem:[%s4643_s3 + $0x88] sm:$0xff]   ;;  %v3731_v2 = vld [vmem:[%s4643_s3 + $0x80] sm:$0xff]  }
  0x22   : > { %v3730_v0 = vld [vmem:[%s4643_s3 + $0xc8] sm:$0xff]   ;;  %v3732_v3 = vld [vmem:[%s4643_s3 + $0xc0] sm:$0xff]   ;;  %v3733_v4 = vld [vmem:[%s4645_s5 + $0x38] sm:$0xff]  }
  0x23   : > { %3349 = vmatpush3.bf16.msra.mxu0 %v3679_v11  ;;  %v3734_v5 = vld [vmem:[%s4645_s5 + $0x78] sm:$0xff]   ;;  %v3735_v6 = vld [vmem:[%s4645_s5 + $0x30] sm:$0xff]   ;;  %v3737_v8 = vld [vmem:[%s4645_s5 + $0x28] sm:$0xff]  }
  0x24   : > { %3369 = vmatpush3.bf16.msra.mxu1 %v3680_v12  ;;  %3350 = vmatprep.subr.bf16.mxu0 %v3842_v1  ;;  %v3736_v7 = vld [vmem:[%s4645_s5 + $0x70] sm:$0xff]   ;;  %v3738_v9 = vld [vmem:[%s4645_s5 + $0x68] sm:$0xff]   ;;  %v3739_v10 = vld [vmem:[%s4645_s5 + $0x20] sm:$0xff]  }
  0x25   : > { %3370 = vmatprep.subr.bf16.mxu1 %v3842_v1  ;;  %v3740_v11 = vld [vmem:[%s4645_s5 + $0x60] sm:$0xff]   ;;  %v3741_v12 = vld [vmem:[%s4645_s5 + $0x18] sm:$0xff]   ;;  %v3745_v16 = vld [vmem:[%s4645_s5 + $0x8] sm:$0xff]  }
  0x27   : > { %3351 = vmatpush3.bf16.msra.mxu0 %v3681_v13  ;;  %v3742_v13 = vld [vmem:[%s4645_s5 + $0x58] sm:$0xff]  }
  0x28   : > { %3371 = vmatpush3.bf16.msra.mxu1 %v3682_v14  ;;  %3352 = vmatprep.subr.bf16.mxu0 %v3842_v1  ;;  %v3743_v14 = vld [vmem:[%s4645_s5 + $0x10] sm:$0xff]  }
  0x29   : > { %3372 = vmatprep.subr.bf16.mxu1 %v3842_v1 }
  0x2b   : > { %3353 = vmatpush3.bf16.msra.mxu0 %v3683_v15  ;;  %v3744_v15 = vld [vmem:[%s4645_s5 + $0x50] sm:$0xff]  }
  0x2c   : > { %3373 = vmatpush3.bf16.msra.mxu1 %v3684_v17  ;;  %3378 = vmatprep.subr.bf16.mxu0 %v3842_v1  ;;  %v3746_v17 = vld [vmem:[%s4645_s5 + $0x48] sm:$0xff]  }
  0x2d   : > { %3398 = vmatprep.subr.bf16.mxu1 %v3842_v1 }
  0x2e   : > { %3355 = vmatmul.mubr.bf16.vlgmr.msra.gmra.mxu0 %v4026_v18 }
  0x2f   : > { %3375 = vmatmul.mubr.bf16.vlgmr.msra.gmra.mxu1 %v4026_v18  ;;  %3379 = vmatpush3.bf16.msra.mxu0 %v3685_v19  ;;  %v3747_v19 = vld [vmem:[%s4645_s5] sm:$0xff]  }
  0x30   : > { %3399 = vmatpush3.bf16.msra.mxu1 %v3686_v20  ;;  %3380 = vmatprep.subr.bf16.mxu0 %v3842_v1  ;;  %v3748_v20 = vld [vmem:[%s4645_s5 + $0x40] sm:$0xff]  }
  0x31   : > { %3400 = vmatprep.subr.bf16.mxu1 %v3842_v1  ;;  %3394 = vmatprep.mubr.msk.bf16.mxu0 %vm3843_vm0, %v3842_v1 }
  0x32   : > { %3414 = vmatprep.mubr.msk.bf16.mxu1 %vm3843_vm0, %v3842_v1 }
  0x33   : > { %3381 = vmatpush3.bf16.msra.mxu0 %v3687_v21  ;;  %v3749_v21 = vld [vmem:[%s4645_s5 + $0xb8] sm:$0xff]  }
  0x34   : > { %3401 = vmatpush3.bf16.msra.mxu1 %v3688_v22  ;;  %3382 = vmatprep.subr.bf16.mxu0 %v3842_v1  ;;  %v3750_v22 = vld [vmem:[%s4645_s5 + $0xf8] sm:$0xff]  }
  0x35   : > { %3402 = vmatprep.subr.bf16.mxu1 %v3842_v1 }
  0x37   : > { %3383 = vmatpush3.bf16.msra.mxu0 %v3689_v23  ;;  %v3751_v23 = vld [vmem:[%s4645_s5 + $0xb0] sm:$0xff]  }
  0x38   : > { %3403 = vmatpush3.bf16.msra.mxu1 %v3690_v24  ;;  %3384 = vmatprep.subr.bf16.mxu0 %v3842_v1  ;;  %v3752_v24 = vld [vmem:[%s4645_s5 + $0xf0] sm:$0xff]  }
  0x39   : > { %3404 = vmatprep.subr.bf16.mxu1 %v3842_v1 }
  0x3b   : > { %3385 = vmatpush3.bf16.msra.mxu0 %v3691_v25  ;;  %v3753_v25 = vld [vmem:[%s4645_s5 + $0xa8] sm:$0xff]  }
  0x3c   : > { %3405 = vmatpush3.bf16.msra.mxu1 %v3692_v26  ;;  %3386 = vmatprep.subr.bf16.mxu0 %v3842_v1  ;;  %v3754_v26 = vld [vmem:[%s4645_s5 + $0xe8] sm:$0xff]  }
  0x3d   : > { %3406 = vmatprep.subr.bf16.mxu1 %v3842_v1 }
  0x3f   : > { %3387 = vmatpush3.bf16.msra.mxu0 %v3693_v27  ;;  %v3755_v27 = vld [vmem:[%s4645_s5 + $0xa0] sm:$0xff]  }
  0x40   : > { %3407 = vmatpush3.bf16.msra.mxu1 %v3694_v28  ;;  %3388 = vmatprep.subr.bf16.mxu0 %v3842_v1  ;;  %v3756_v28 = vld [vmem:[%s4645_s5 + $0xe0] sm:$0xff]  }
  0x41   : > { %3408 = vmatprep.subr.bf16.mxu1 %v3842_v1 }
  0x43   : > { %3389 = vmatpush3.bf16.msra.mxu0 %v3695_v29  ;;  %v3757_v29 = vld [vmem:[%s4645_s5 + $0x98] sm:$0xff]  }
  0x44   : > { %3409 = vmatpush3.bf16.msra.mxu1 %v3696_v30  ;;  %3390 = vmatprep.subr.bf16.mxu0 %v3842_v1  ;;  %v3758_v30 = vld [vmem:[%s4645_s5 + $0xd8] sm:$0xff]  }
  0x45   : > { %3410 = vmatprep.subr.bf16.mxu1 %v3842_v1 }
  0x47   : > { %3391 = vmatpush3.bf16.msra.mxu0 %v3697_v31  ;;  %v3759_v31 = vld [vmem:[%s4645_s5 + $0x90] sm:$0xff]  }
  0x48   : > { %3411 = vmatpush3.bf16.msra.mxu1 %v3698_v32  ;;  %3392 = vmatprep.subr.bf16.mxu0 %v3842_v1  ;;  %v3760_v32 = vld [vmem:[%s4645_s5 + $0xd0] sm:$0xff]  }
  0x49   : > { %3412 = vmatprep.subr.bf16.mxu1 %v3842_v1 }
  0x4b   : > { %3393 = vmatpush3.bf16.msra.mxu0 %v3699_v33  ;;  %v3761_v33 = vld [vmem:[%s4645_s5 + $0x88] sm:$0xff]  }
  0x4c   : > { %3413 = vmatpush3.bf16.msra.mxu1 %v3700_v34  ;;  %3418 = vmatprep.subr.bf16.mxu0 %v3842_v1  ;;  %v3762_v34 = vld [vmem:[%s4645_s5 + $0xc8] sm:$0xff]  }
  0x4d   : > { %3438 = vmatprep.subr.bf16.mxu1 %v3842_v1 }
  0x4e   : > { %3395 = vmatmul.mubr.bf16.vlgmr.msra.gmra.mxu0 %v4026_v18 }
  0x4f   : > { %3415 = vmatmul.mubr.bf16.vlgmr.msra.gmra.mxu1 %v4026_v18  ;;  %3419 = vmatpush3.bf16.msra.mxu0 %v3701_v35  ;;  %v3763_v35 = vld [vmem:[%s4645_s5 + $0x80] sm:$0xff]  }
  0x50   : > { %3439 = vmatpush3.bf16.msra.mxu1 %v3702_v36  ;;  %3420 = vmatprep.subr.bf16.mxu0 %v3842_v1  ;;  %v3764_v36 = vld [vmem:[%s4645_s5 + $0xc0] sm:$0xff]  }
  0x51   : > { %3440 = vmatprep.subr.bf16.mxu1 %v3842_v1  ;;  %3434 = vmatprep.mubr.msk.bf16.mxu0 %vm3843_vm0, %v3842_v1 }
  0x52   : > { %3454 = vmatprep.mubr.msk.bf16.mxu1 %vm3843_vm0, %v3842_v1 }
  0x53   : > { %3421 = vmatpush3.bf16.msra.mxu0 %v3703_v37 }
  0x54   : > { %3441 = vmatpush3.bf16.msra.mxu1 %v3704_v38  ;;  %3422 = vmatprep.subr.bf16.mxu0 %v3842_v1 }
  0x55   : > { %3442 = vmatprep.subr.bf16.mxu1 %v3842_v1 }
  0x57   : > { %3423 = vmatpush3.bf16.msra.mxu0 %v3705_v39 }
  0x58   : > { %3443 = vmatpush3.bf16.msra.mxu1 %v3706_v40  ;;  %3424 = vmatprep.subr.bf16.mxu0 %v3842_v1 }
  0x59   : > { %3444 = vmatprep.subr.bf16.mxu1 %v3842_v1 }
  0x5b   : > { %3425 = vmatpush3.bf16.msra.mxu0 %v3707_v41 }
  0x5c   : > { %3445 = vmatpush3.bf16.msra.mxu1 %v3708_v42  ;;  %3426 = vmatprep.subr.bf16.mxu0 %v3842_v1 }
  0x5d   : > { %3446 = vmatprep.subr.bf16.mxu1 %v3842_v1 }
  0x5f   : > { %3427 = vmatpush3.bf16.msra.mxu0 %v3709_v43 }
  0x60   : > { %3447 = vmatpush3.bf16.msra.mxu1 %v3710_v44  ;;  %3428 = vmatprep.subr.bf16.mxu0 %v3842_v1 }
  0x61   : > { %3448 = vmatprep.subr.bf16.mxu1 %v3842_v1 }
  0x63   : > { %3429 = vmatpush3.bf16.msra.mxu0 %v3711_v45 }
  0x64   : > { %3449 = vmatpush3.bf16.msra.mxu1 %v3712_v46  ;;  %3430 = vmatprep.subr.bf16.mxu0 %v3842_v1 }
  0x65   : > { %3450 = vmatprep.subr.bf16.mxu1 %v3842_v1 }
  0x67   : > { %3431 = vmatpush3.bf16.msra.mxu0 %v3713_v47 }
  0x68   : > { %3451 = vmatpush3.bf16.msra.mxu1 %v3714_v48  ;;  %3432 = vmatprep.subr.bf16.mxu0 %v3842_v1 }
  0x69   : > { %3452 = vmatprep.subr.bf16.mxu1 %v3842_v1 }
  0x6b   : > { %3433 = vmatpush3.bf16.msra.mxu0 %v3715_v49 }
  0x6c   : > { %3453 = vmatpush3.bf16.msra.mxu1 %v3716_v50  ;;  %3458 = vmatprep.subr.bf16.mxu0 %v3842_v1 }
  0x6d   : > { %3478 = vmatprep.subr.bf16.mxu1 %v3842_v1 }
  0x6e   : > { %3435 = vmatmul.mubr.bf16.vlgmr.msra.gmra.mxu0 %v4026_v18 }
  0x6f   : > { %3455 = vmatmul.mubr.bf16.vlgmr.msra.gmra.mxu1 %v4026_v18  ;;  %3459 = vmatpush3.bf16.msra.mxu0 %v3717_v51 }
  0x70   : > { %3479 = vmatpush3.bf16.msra.mxu1 %v3718_v52  ;;  %3460 = vmatprep.subr.bf16.mxu0 %v3842_v1  ;;  %v3048_v52 = vld [vmem:[%s4644_s4] ss:$0 sm:$0xff] }
  0x71   : > { %3480 = vmatprep.subr.bf16.mxu1 %v3842_v1  ;;  %3474 = vmatprep.mubr.msk.bf16.mxu0 %vm3843_vm0, %v3842_v1 }
  0x72   : > { %3494 = vmatprep.mubr.msk.bf16.mxu1 %vm3843_vm0, %v3842_v1 }
  0x73   : > { %3461 = vmatpush3.bf16.msra.mxu0 %v3719_v53  ;;  %v3049_v53 = vld [vmem:[%s4644_s4 + $0x1] ss:$0 sm:$0xff] }
  0x74   : > { %3481 = vmatpush3.bf16.msra.mxu1 %v3720_v54  ;;  %3462 = vmatprep.subr.bf16.mxu0 %v3842_v1 }
  0x75   : > { %3482 = vmatprep.subr.bf16.mxu1 %v3842_v1 }
  0x77   : > { %3463 = vmatpush3.bf16.msra.mxu0 %v3721_v55 }
  0x78   : > { %3483 = vmatpush3.bf16.msra.mxu1 %v3722_v56  ;;  %3464 = vmatprep.subr.bf16.mxu0 %v3842_v1 }
  0x79   : > { %3484 = vmatprep.subr.bf16.mxu1 %v3842_v1 }
  0x7b   : > { %3465 = vmatpush3.bf16.msra.mxu0 %v3723_v57 }
  0x7c   : > { %3485 = vmatpush3.bf16.msra.mxu1 %v3724_v58  ;;  %3466 = vmatprep.subr.bf16.mxu0 %v3842_v1 }
  0x7d   : > { %3486 = vmatprep.subr.bf16.mxu1 %v3842_v1 }
  0x7f   : > { %3467 = vmatpush3.bf16.msra.mxu0 %v3725_v59 }
  0x80   : > { %3487 = vmatpush3.bf16.msra.mxu1 %v3726_v60  ;;  %3468 = vmatprep.subr.bf16.mxu0 %v3842_v1 }
  0x81   : > { %3488 = vmatprep.subr.bf16.mxu1 %v3842_v1 }
  0x83   : > { %3469 = vmatpush3.bf16.msra.mxu0 %v3727_v61  ;;  %v3012_v61 = vld [vmem:[%s4642_s2] ss:$0 sm:$0xff] }
  0x84   : > { %3489 = vmatpush3.bf16.msra.mxu1 %v3728_v62  ;;  %3470 = vmatprep.subr.bf16.mxu0 %v3842_v1 }
  0x85   : > { %3490 = vmatprep.subr.bf16.mxu1 %v3842_v1 }
  0x87   : > { %3471 = vmatpush3.bf16.msra.mxu0 %v3729_v63 }
  0x88   : > { %3491 = vmatpush3.bf16.msra.mxu1 %v3730_v0  ;;  %3472 = vmatprep.subr.bf16.mxu0 %v3842_v1  ;;  %v3013_v0 = vld [vmem:[%s4642_s2 + $0x1] ss:$0 sm:$0xff] }
  0x89   : > { %3492 = vmatprep.subr.bf16.mxu1 %v3842_v1 }
  0x8b   : > { %3473 = vmatpush3.bf16.msra.mxu0 %v3731_v2 }
  0x8c   : > { %3493 = vmatpush3.bf16.msra.mxu1 %v3732_v3  ;;  %3498 = vmatprep.subr.bf16.mxu0 %v3842_v1 }
  0x8d   : > { %3518 = vmatprep.subr.bf16.mxu1 %v3842_v1 }
  0x8e   : > { %3475 = vmatmul.mubr.bf16.vlgmr.msra.gmra.mxu0 %v4026_v18 }
  0x8f   : > { %3495 = vmatmul.mubr.bf16.vlgmr.msra.gmra.mxu1 %v4026_v18  ;;  %3499 = vmatpush3.bf16.msra.mxu0 %v3733_v4 }
  0x90   : > { %3519 = vmatpush3.bf16.msra.mxu1 %v3734_v5  ;;  %3500 = vmatprep.subr.bf16.mxu0 %v3842_v1 }
  0x91   : > { %3520 = vmatprep.subr.bf16.mxu1 %v3842_v1  ;;  %3514 = vmatprep.mubr.msk.bf16.mxu0 %vm3843_vm0, %v3842_v1 }
  0x92   : > { %3534 = vmatprep.mubr.msk.bf16.mxu1 %vm3843_vm0, %v3842_v1 }
  0x93   : > { %3501 = vmatpush3.bf16.msra.mxu0 %v3735_v6 }
  0x94   : > { %3521 = vmatpush3.bf16.msra.mxu1 %v3736_v7  ;;  %3502 = vmatprep.subr.bf16.mxu0 %v3842_v1 }
  0x95   : > { %3522 = vmatprep.subr.bf16.mxu1 %v3842_v1 }
  0x97   : > { %3503 = vmatpush3.bf16.msra.mxu0 %v3737_v8 }
  0x98   : > { %3523 = vmatpush3.bf16.msra.mxu1 %v3738_v9  ;;  %3504 = vmatprep.subr.bf16.mxu0 %v3842_v1 }
  0x99   : > { %3524 = vmatprep.subr.bf16.mxu1 %v3842_v1 }
  0x9b   : > { %3505 = vmatpush3.bf16.msra.mxu0 %v3739_v10 }
  0x9c   : > { %3525 = vmatpush3.bf16.msra.mxu1 %v3740_v11  ;;  %3506 = vmatprep.subr.bf16.mxu0 %v3842_v1  ;;  %v3050_v11 = vld [vmem:[%s4644_s4 + $0x2] ss:$0 sm:$0xff] }
  0x9d   : > { %3526 = vmatprep.subr.bf16.mxu1 %v3842_v1 }
  0x9f   : > { %3507 = vmatpush3.bf16.msra.mxu0 %v3741_v12  ;;  %v3051_v12 = vld [vmem:[%s4644_s4 + $0x3] ss:$0 sm:$0xff] }
  0xa0   : > { %3527 = vmatpush3.bf16.msra.mxu1 %v3742_v13  ;;  %3508 = vmatprep.subr.bf16.mxu0 %v3842_v1 }
  0xa1   : > { %3528 = vmatprep.subr.bf16.mxu1 %v3842_v1 }
  0xa3   : > { %3509 = vmatpush3.bf16.msra.mxu0 %v3743_v14 }
  0xa4   : > { %3529 = vmatpush3.bf16.msra.mxu1 %v3744_v15  ;;  %3510 = vmatprep.subr.bf16.mxu0 %v3842_v1 }
  0xa5   : > { %3530 = vmatprep.subr.bf16.mxu1 %v3842_v1 }
  0xa7   : > { %3511 = vmatpush3.bf16.msra.mxu0 %v3745_v16 }
  0xa8   : > { %3531 = vmatpush3.bf16.msra.mxu1 %v3746_v17  ;;  %3512 = vmatprep.subr.bf16.mxu0 %v3842_v1 }
  0xa9   : > { %3532 = vmatprep.subr.bf16.mxu1 %v3842_v1 }
  0xab   : > { %3513 = vmatpush3.bf16.msra.mxu0 %v3747_v19 }
  0xac   : > { %3533 = vmatpush3.bf16.msra.mxu1 %v3748_v20  ;;  %3538 = vmatprep.subr.bf16.mxu0 %v3842_v1 }
  0xad   : > { %3558 = vmatprep.subr.bf16.mxu1 %v3842_v1 }
  0xae   : > { %3515 = vmatmul.mubr.bf16.vlgmr.msra.gmra.mxu0 %v4026_v18 }
  0xaf   : > { %3535 = vmatmul.mubr.bf16.vlgmr.msra.gmra.mxu1 %v4026_v18  ;;  %3539 = vmatpush3.bf16.msra.mxu0 %v3749_v21  ;;  %v3014_v21 = vld [vmem:[%s4642_s2 + $0x2] ss:$0 sm:$0xff] }
  0xb0   : > { %3559 = vmatpush3.bf16.msra.mxu1 %v3750_v22  ;;  %3540 = vmatprep.subr.bf16.mxu0 %v3842_v1 }
  0xb1   : > { %3560 = vmatprep.subr.bf16.mxu1 %v3842_v1  ;;  %3554 = vmatprep.mubr.msk.bf16.mxu0 %vm3843_vm0, %v3842_v1 }
  0xb2   : > { %3574 = vmatprep.mubr.msk.bf16.mxu1 %vm3843_vm0, %v3842_v1 }
  0xb3   : > { %3541 = vmatpush3.bf16.msra.mxu0 %v3751_v23 }
  0xb4   : > { %3561 = vmatpush3.bf16.msra.mxu1 %v3752_v24  ;;  %3542 = vmatprep.subr.bf16.mxu0 %v3842_v1  ;;  %v3015_v24 = vld [vmem:[%s4642_s2 + $0x3] ss:$0 sm:$0xff] }
  0xb5   : > { %3562 = vmatprep.subr.bf16.mxu1 %v3842_v1 }
  0xb7   : > { %3543 = vmatpush3.bf16.msra.mxu0 %v3753_v25 }
  0xb8   : > { %3563 = vmatpush3.bf16.msra.mxu1 %v3754_v26  ;;  %3544 = vmatprep.subr.bf16.mxu0 %v3842_v1 }
  0xb9   : > { %3564 = vmatprep.subr.bf16.mxu1 %v3842_v1 }
  0xbb   : > { %3545 = vmatpush3.bf16.msra.mxu0 %v3755_v27 }
  0xbc   : > { %3565 = vmatpush3.bf16.msra.mxu1 %v3756_v28  ;;  %3546 = vmatprep.subr.bf16.mxu0 %v3842_v1 }
  0xbd   : > { %3566 = vmatprep.subr.bf16.mxu1 %v3842_v1 }
  0xbf   : > { %3547 = vmatpush3.bf16.msra.mxu0 %v3757_v29 }
  0xc0   : > { %3567 = vmatpush3.bf16.msra.mxu1 %v3758_v30  ;;  %3548 = vmatprep.subr.bf16.mxu0 %v3842_v1 }
  0xc1   : > { %3568 = vmatprep.subr.bf16.mxu1 %v3842_v1 }
  0xc3   : > { %3549 = vmatpush3.bf16.msra.mxu0 %v3759_v31 }
  0xc4   : > { %3569 = vmatpush3.bf16.msra.mxu1 %v3760_v32  ;;  %3550 = vmatprep.subr.bf16.mxu0 %v3842_v1 }
  0xc5   : > { %3570 = vmatprep.subr.bf16.mxu1 %v3842_v1 }
  0xc7   : > { %3551 = vmatpush3.bf16.msra.mxu0 %v3761_v33 }
  0xc8   : > { %3571 = vmatpush3.bf16.msra.mxu1 %v3762_v34  ;;  %3552 = vmatprep.subr.bf16.mxu0 %v3842_v1  ;;  %v3084_v34 = vld [vmem:[%s4646_s6] ss:$0 sm:$0xff] }
  0xc9   : > { %3572 = vmatprep.subr.bf16.mxu1 %v3842_v1 }
  0xcb   : > { %3553 = vmatpush3.bf16.msra.mxu0 %v3763_v35  ;;  %v3085_v35 = vld [vmem:[%s4646_s6 + $0x1] ss:$0 sm:$0xff] }
  0xcc   : > { %3573 = vmatpush3.bf16.msra.mxu1 %v3764_v36  ;;  %3578 = vmatprep.subr.bf16.mxu0 %v3842_v1 }
  0xcd   : > { %3584 = vmatprep.subr.bf16.mxu1 %v3842_v1 }
  0xce   : > { %3555 = vmatmul.mubr.bf16.vlgmr.msra.gmra.mxu0 %v4026_v18 }
  0xcf   : > { %3575 = vmatmul.mubr.bf16.vlgmr.msra.gmra.mxu1 %v4026_v18  ;;  %3580 = vmatprep.mubr.msk.bf16.mxu0 %vm3843_vm0, %v3842_v1 }
  0xd0   : > { %3586 = vmatprep.mubr.msk.bf16.mxu1 %vm3843_vm0, %v3842_v1 }
  0xee   : > { %v721_v37 = vpop.f32.mrf.mxu0 }
  0xef   : > { %v809_v38 = vpop.f32.mrf.mxu1  ;;  %v722_v6 = vadd.f32 %v3012_v61, %v721_v37 }
  0xf0   : > { %v3356_v39 = vpop.f32.mrf.mxu0  ;;  %v810_v8 = vadd.f32 %v3013_v0, %v809_v38 }
  0xf1   : > { %v3376_v40 = vpop.f32.mrf.mxu1  ;;  %v1879_v9 = vpack.c.bf16 %v722_v6, %v722_v6 }
  0xf2   : > { %v724_v41 = vpop.f32.mrf.mxu0  ;;  %v1880_v10 = vpack.c.bf16 %v810_v8, %v810_v8 }
  0xf3   : > { %v812_v42 = vpop.f32.mrf.mxu1 }
  0xf4   : > { %v3357_v43 = vpop.f32.mrf.mxu0 }
  0xf5   : > { %v3377_v44 = vpop.f32.mrf.mxu1 }
 0x10e   : > { %v897_v45 = vpop.f32.mrf.mxu0 }
 0x10f   : > { %v985_v46 = vpop.f32.mrf.mxu1  ;;  %v898_v29 = vadd.f32 %v3014_v21, %v897_v45 }
 0x110   : > { %v3396_v47 = vpop.f32.mrf.mxu0  ;;  %v986_v31 = vadd.f32 %v3015_v24, %v985_v46 }
 0x111   : > { %v3416_v48 = vpop.f32.mrf.mxu1  ;;  %v1881_v32 = vpack.c.bf16 %v898_v29, %v898_v29 }
 0x112   : > { %v900_v49 = vpop.f32.mrf.mxu0  ;;  %v1882_v33 = vpack.c.bf16 %v986_v31, %v986_v31 }
 0x113   : > { %v988_v18 = vpop.f32.mrf.mxu1 }
 0x114   : > { %v3397_v50 = vpop.f32.mrf.mxu0  ;;  %v3086_v18 = vld [vmem:[%s4646_s6 + $0x2] ss:$0 sm:$0xff] }
 0x115   : > { %v3417_v51 = vpop.f32.mrf.mxu1  ;;  %v3087_v50 = vld [vmem:[%s4646_s6 + $0x3] ss:$0 sm:$0xff] }
 0x12e   : > { %v1165_v54 = vpop.f32.mrf.mxu0 }
 0x12f   : > { %v1166_v55 = vadd.f32 %v3048_v52, %v1165_v54  ;;  %v1253_v56 = vpop.f32.mrf.mxu1 }
 0x130   : > { %v1254_v57 = vadd.f32 %v3049_v53, %v1253_v56  ;;  %v3436_v58 = vpop.f32.mrf.mxu0 }
 0x131   : > { %v1883_v59 = vpack.c.bf16 %v1166_v55, %v1166_v55  ;;  %v3456_v60 = vpop.f32.mrf.mxu1 }
 0x132   : > { %v1884_v62 = vpack.c.bf16 %v1254_v57, %v1254_v57  ;;  %v1168_v63 = vpop.f32.mrf.mxu0 }
 0x133   : > { %v1892_v2 = vsel %vm1887_vm1, %v1883_v59, 0  ;;  %v1256_v3 = vpop.f32.mrf.mxu1 }
 0x134   : > { %v1938_v4 = vsel %vm1887_vm1, %v1884_v62, 0  ;;  %v3437_v5 = vpop.f32.mrf.mxu0  ;;  %3579 = vmatpush3.bf16.xpose.msra.mxu0 %v1892_v2 }
 0x135   : > { %v3457_v7 = vpop.f32.mrf.mxu1  ;;  %3585 = vmatpush3.bf16.xpose.msra.mxu1 %v1938_v4  ;;  %3590 = vmatprep.subr.bf16.mxu0 %v3842_v1 }
 0x136   : > { %3596 = vmatprep.subr.bf16.mxu1 %v3842_v1 }
 0x13b   : > { %3581 = vmatmul.mubr.msk.bf16.vlgmr.msra.gmra.mxu0 %vm1887_vm1, %v1879_v9 }
 0x13c   : > { %3587 = vmatmul.mubr.msk.bf16.vlgmr.msra.gmra.mxu1 %vm1887_vm1, %v1880_v10  ;;  %3592 = vmatprep.mubr.msk.bf16.mxu0 %vm3843_vm0, %v3842_v1 }
 0x13d   : > { %3598 = vmatprep.mubr.msk.bf16.mxu1 %vm3843_vm0, %v3842_v1 }
 0x14e   : > { %v1341_v13 = vpop.f32.mrf.mxu0 }
 0x14f   : > { %v1342_v14 = vadd.f32 %v3050_v11, %v1341_v13  ;;  %v1429_v15 = vpop.f32.mrf.mxu1 }
 0x150   : > { %v1430_v16 = vadd.f32 %v3051_v12, %v1429_v15  ;;  %v3476_v17 = vpop.f32.mrf.mxu0 }
 0x151   : > { %v1885_v19 = vpack.c.bf16 %v1342_v14, %v1342_v14  ;;  %v3496_v20 = vpop.f32.mrf.mxu1 }
 0x152   : > { %v1886_v22 = vpack.c.bf16 %v1430_v16, %v1430_v16  ;;  %v1344_v23 = vpop.f32.mrf.mxu0 }
 0x153   : > { %v1984_v25 = vsel %vm1887_vm1, %v1885_v19, 0  ;;  %v1432_v26 = vpop.f32.mrf.mxu1 }
 0x154   : > { %v2030_v27 = vsel %vm1887_vm1, %v1886_v22, 0  ;;  %v3477_v28 = vpop.f32.mrf.mxu0  ;;  %3591 = vmatpush3.bf16.xpose.msra.mxu0 %v1984_v25 }
 0x155   : > { %v3497_v30 = vpop.f32.mrf.mxu1  ;;  %3597 = vmatpush3.bf16.xpose.msra.mxu1 %v2030_v27  ;;  %3602 = vmatprep.subr.bf16.mxu0 %v3842_v1 }
 0x156   : > { %3608 = vmatprep.subr.bf16.mxu1 %v3842_v1 }
 0x15b   : > { %3593 = vmatmul.mubr.msk.bf16.vlgmr.msra.gmra.mxu0 %vm1887_vm1, %v1881_v32 }
 0x15c   : > { %3599 = vmatmul.mubr.msk.bf16.vlgmr.msra.gmra.mxu1 %vm1887_vm1, %v1882_v33  ;;  %3604 = vmatprep.mubr.msk.bf16.mxu0 %vm3843_vm0, %v3842_v1 }
 0x15d   : > { %3610 = vmatprep.mubr.msk.bf16.mxu1 %vm3843_vm0, %v3842_v1 }
 0x16e   : > { %v1609_v36 = vpop.f32.mrf.mxu0 }
 0x16f   : > { %v1610_v37 = vadd.f32 %v3084_v34, %v1609_v36  ;;  %v1697_v38 = vpop.f32.mrf.mxu1 }
 0x170   : > { %v3516_v39 = vpop.f32.mrf.mxu0  ;;  %v1698_v40 = vadd.f32 %v3085_v35, %v1697_v38 }
 0x171   : > { %v2125_v41 = vpack.c.bf16 %v1610_v37, %v1610_v37  ;;  %v3536_v42 = vpop.f32.mrf.mxu1 }
 0x172   : > { %v1612_v43 = vpop.f32.mrf.mxu0  ;;  %v2126_v44 = vpack.c.bf16 %v1698_v40, %v1698_v40 }
 0x173   : > { %v2134_v45 = vsel %vm2132_vm2, %v2125_v41, 0  ;;  %v1700_v46 = vpop.f32.mrf.mxu1 }
 0x174   : > { %v2180_v47 = vsel %vm2132_vm2, %v2126_v44, 0  ;;  %v3517_v48 = vpop.f32.mrf.mxu0  ;;  %3603 = vmatpush3.bf16.msra.mxu0 %v2134_v45 }
 0x175   : > { %v3537_v49 = vpop.f32.mrf.mxu1  ;;  %3609 = vmatpush3.bf16.msra.mxu1 %v2180_v47  ;;  %3614 = vmatprep.subr.bf16.mxu0 %v3842_v1 }
 0x176   : > { %3620 = vmatprep.subr.bf16.mxu1 %v3842_v1 }
 0x18e   : > { %v1785_v51 = vpop.f32.mrf.mxu0 }
 0x18f   : > { %v1786_v52 = vadd.f32 %v3086_v18, %v1785_v51  ;;  %v1873_v53 = vpop.f32.mrf.mxu1 }
 0x190   : > { %v1874_v54 = vadd.f32 %v3087_v50, %v1873_v53  ;;  %v3556_v55 = vpop.f32.mrf.mxu0 }
 0x191   : > { %v2127_v56 = vpack.c.bf16 %v1786_v52, %v1786_v52  ;;  %v3576_v57 = vpop.f32.mrf.mxu1 }
 0x192   : > { %v2128_v58 = vpack.c.bf16 %v1874_v54, %v1874_v54  ;;  %v1788_v59 = vpop.f32.mrf.mxu0 }
 0x193   : > { %v4447_v60 = vsel %vm2132_vm2, %v2127_v56, 0  ;;  %v1876_v61 = vpop.f32.mrf.mxu1 }
 0x194   : > { %v4450_v62 = vsel %vm2132_vm2, %v2128_v58, 0  ;;  %v3557_v63 = vpop.f32.mrf.mxu0  ;;  %v3765_v58 = vld [vmem:[%s4647_s7 + $0x8] sm:$0xff]  }
 0x195   : > { %v3577_v0 = vpop.f32.mrf.mxu1  ;;  %v3766_v63 = vld [vmem:[%s4647_s7] sm:$0xff]  }
 0x196   : > { %v3767_v0 = vld [vmem:[%s4647_s7 + $0x18] sm:$0xff]  }
 0x1fb   : > { %v1928_v2 = vpop.f32.mrf.mxu0 }
 0x1fc   : > { %v2072_v3 = vmul.f32 0.17677669, %v1928_v2  ;;  %v1974_v4 = vpop.f32.mrf.mxu1  ;;  %v3768_v2 = vld [vmem:[%s4647_s7 + $0x10] sm:$0xff]  }
 0x1fd   : > { %v3582_v5 = vpop.f32.mrf.mxu0  ;;  %v2073_v6 = vmul.f32 0.17677669, %v1974_v4  ;;  %v3769_v4 = vld [vmem:[%s4647_s7 + $0x28] sm:$0xff]  }
 0x1fe   : > { %v3588_v7 = vpop.f32.mrf.mxu1  ;;  %v2077_v8 = vsel %vm2076_vm3, %v2072_v3, -inf }
 0x1ff   : > { %2078 = vmax.xlane.f32.xlu0 %v2077_v8  ;;  %v1931_v9 = vpop.f32.mrf.mxu0  ;;  %v2080_v13 = vsel %vm2076_vm3, %v2073_v6, -inf }
 0x200   : > { %v1977_v10 = vpop.f32.mrf.mxu1  ;;  %v3770_v9 = vld [vmem:[%s4647_s7 + $0x20] sm:$0xff]  }
 0x201   : > { %v3583_v11 = vpop.f32.mrf.mxu0  ;;  %v3771_v10 = vld [vmem:[%s4647_s7 + $0x38] sm:$0xff]  }
 0x202   : > { %v3589_v12 = vpop.f32.mrf.mxu1 }
 0x203   : > { %2081 = vmax.xlane.f32.xlu0 %v2080_v13 }
 0x21b   : > { %v2020_v14 = vpop.f32.mrf.mxu0 }
 0x21c   : > { %v2074_v15 = vmul.f32 0.17677669, %v2020_v14  ;;  %v2066_v16 = vpop.f32.mrf.mxu1 }
 0x21d   : > { %v3594_v17 = vpop.f32.mrf.mxu0  ;;  %v2075_v19 = vmul.f32 0.17677669, %v2066_v16 }
 0x21e   : > { %v3600_v20 = vpop.f32.mrf.mxu1  ;;  %v2083_v21 = vsel %vm2076_vm3, %v2074_v15, -inf }
 0x21f   : > { %2084 = vmax.xlane.f32.xlu1 %v2083_v21  ;;  %v2023_v22 = vpop.f32.mrf.mxu0  ;;  %v2086_v26 = vsel %vm2076_vm3, %v2075_v19, -inf }
 0x220   : > { %v2069_v23 = vpop.f32.mrf.mxu1 }
 0x221   : > { %v3595_v24 = vpop.f32.mrf.mxu0 }
 0x222   : > { %v3601_v25 = vpop.f32.mrf.mxu1 }
 0x223   : > { %2087 = vmax.xlane.f32.xlu1 %v2086_v26 }
 0x288   : > { %v2079_v27 = vpop.xlane.xlu0 %2078 }
 0x289   : > { %v2089_v28 = vsub.f32 %v2072_v3, %v2079_v27 }
 0x28b   : > { %v2093_v29 = vmul.f32 1.442695, %v2089_v28 }
 0x28c   : > { %v2082_v30 = vpop.xlane.xlu0 %2081 }
 0x28d   : > { %3813 = vpow2.f32 %v2093_v29  ;;  %v2090_v31 = vsub.f32 %v2073_v6, %v2082_v30 }
 0x28f   : > { %v2095_v32 = vmul.f32 1.442695, %v2090_v31 }
 0x291   : > { %3815 = vpow2.f32 %v2095_v32 }
 0x29a   : > { %v3814_v33 = vpop.eup %3813 }
 0x29b   : > { %v2101_v34 = vsel %vm2076_vm3, %v3814_v33, 0.0 }
 0x29c   : > { %2102 = vadd.xlane.f32.xlu0 %v2101_v34 }
 0x29e   : > { %v3816_v35 = vpop.eup %3815 }
 0x29f   : > { %v2104_v36 = vsel %vm2076_vm3, %v3816_v35, 0.0 }
 0x2a0   : > { %2105 = vadd.xlane.f32.xlu1 %v2104_v36 }
 0x2a8   : > { %v2085_v37 = vpop.xlane.xlu1 %2084 }
 0x2a9   : > { %v2091_v38 = vsub.f32 %v2074_v15, %v2085_v37  ;;  %v3772_v15 = vld [vmem:[%s4647_s7 + $0x30] sm:$0xff]  }
 0x2ab   : > { %v2097_v39 = vmul.f32 1.442695, %v2091_v38 }
 0x2ac   : > { %v2088_v40 = vpop.xlane.xlu1 %2087 }
 0x2ad   : > { %3817 = vpow2.f32 %v2097_v39  ;;  %v2092_v41 = vsub.f32 %v2075_v19, %v2088_v40 }
 0x2af   : > { %v2099_v42 = vmul.f32 1.442695, %v2092_v41  ;;  %v3140_v41 = vld [vmem:[%s4648_s8] ss:$0 sm:$0xff] }
 0x2b1   : > { %3819 = vpow2.f32 %v2099_v42 }
 0x2ba   : > { %v3818_v43 = vpop.eup %3817 }
 0x2bb   : > { %v2107_v44 = vsel %vm2076_vm3, %v3818_v43, 0.0 }
 0x2bc   : > { %2108 = vadd.xlane.f32.xlu0 %v2107_v44 }
 0x2be   : > { %v3820_v45 = vpop.eup %3819 }
 0x2bf   : > { %v2110_v46 = vsel %vm2076_vm3, %v3820_v45, 0.0 }
 0x2c0   : > { %2111 = vadd.xlane.f32.xlu1 %v2110_v46 }
 0x325   : > { %v2103_v47 = vpop.xlane.xlu0 %2102 }
 0x326   : > { %3821 = vrcp.f32 %v2103_v47  ;;  %v3833_v47 = vld [vmem:[%s4014_s20] sm:$0xff] }
 0x329   : > { %v2106_v48 = vpop.xlane.xlu1 %2105 }
 0x32a   : > { %3823 = vrcp.f32 %v2106_v48 }
 0x333   : > { %v3822_v49 = vpop.eup %3821 }
 0x334   : > { %v2117_v18 = vmul.f32 %v3822_v49, %v3814_v33 }
 0x336   : > { %v2121_v50 = vpack.c.bf16 %v2117_v18, %v2117_v18  ;;  %v3773_v18 = vld [vmem:[%s4651_s11 + $0x70] ss:$8 sps:$4 sm:$0xff]  }
 0x337   : > { %v3824_v51 = vpop.eup %3823 }
 0x338   : > { %3605 = vmatmul.mubr.msk.bf16.vlgmr.msra.gmra.mxu0 %vm2076_vm3, %v2121_v50  ;;  %v2118_v52 = vmul.f32 %v3824_v51, %v3816_v35  ;;  %v3775_v50 = vld [vmem:[%s4651_s11 + $0x74] ss:$8 sps:$4 sm:$0xff]   ;;  %v3778_v51 = vld [vmem:[%s4651_s11 + $0x64] ss:$8 sps:$4 sm:$0xff]  }
 0x339   : > { %3615 = vmatpush3.bf16.msra.mxu0 %v4447_v60  ;;  %3616 = vmatprep.mubr.msk.bf16.mxu0 %vm3843_vm0, %v3842_v1 }
 0x33a   : > { %v2122_v53 = vpack.c.bf16 %v2118_v52, %v2118_v52  ;;  %3626 = vmatprep.subr.bf16.mxu0 %v3842_v1  ;;  %v3776_v52 = vld [vmem:[%s4651_s11 + $0x60] ss:$8 sps:$4 sm:$0xff]  }
 0x33c   : > { %3611 = vmatmul.mubr.msk.bf16.vlgmr.msra.gmra.mxu1 %vm2076_vm3, %v2122_v53 }
 0x33d   : > { %3621 = vmatpush3.bf16.msra.mxu1 %v4450_v62  ;;  %3622 = vmatprep.mubr.msk.bf16.mxu1 %vm3843_vm0, %v3842_v1 }
 0x33e   : > { %3634 = vmatprep.subr.bf16.mxu1 %v3842_v1 }
 0x345   : > { %v2109_v54 = vpop.xlane.xlu0 %2108 }
 0x346   : > { %3825 = vrcp.f32 %v2109_v54 }
 0x349   : > { %v2112_v55 = vpop.xlane.xlu1 %2111 }
 0x34a   : > { %3827 = vrcp.f32 %v2112_v55 }
 0x353   : > { %v3826_v56 = vpop.eup %3825 }
 0x354   : > { %v2119_v57 = vmul.f32 %v3826_v56, %v3818_v43 }
 0x356   : > { %v2123_v59 = vpack.c.bf16 %v2119_v57, %v2119_v57  ;;  %v3781_v57 = vld [vmem:[%s4651_s11 + $0x54] ss:$8 sps:$4 sm:$0xff]  }
 0x357   : > { %v3828_v60 = vpop.eup %3827 }
 0x358   : > { %3617 = vmatmul.mubr.msk.bf16.vlgmr.msra.gmra.mxu0 %vm2076_vm3, %v2123_v59  ;;  %v2120_v61 = vmul.f32 %v3828_v60, %v3820_v45  ;;  %v3782_v59 = vld [vmem:[%s4651_s11 + $0x40] ss:$8 sps:$4 sm:$0xff]   ;;  %v3784_v60 = vld [vmem:[%s4651_s11 + $0x44] ss:$8 sps:$4 sm:$0xff]  }
 0x359   : > { %3627 = vmatpush3.bf16.msra.mxu0 %v3765_v58  ;;  %3630 = vmatprep.mubr.msk.bf16.mxu0 %vm3843_vm0, %v3842_v1  ;;  %v3779_v58 = vld [vmem:[%s4651_s11 + $0x50] ss:$8 sps:$4 sm:$0xff]  }
 0x35a   : > { %v2124_v62 = vpack.c.bf16 %v2120_v61, %v2120_v61  ;;  %3628 = vmatprep.subr.bf16.mxu0 %v3842_v1  ;;  %v3787_v61 = vld [vmem:[%s4651_s11 + $0x34] ss:$8 sps:$4 sm:$0xff]  }
 0x35c   : > { %3623 = vmatmul.mubr.msk.bf16.vlgmr.msra.gmra.mxu1 %vm2076_vm3, %v2124_v62  ;;  %v3785_v62 = vld [vmem:[%s4651_s11 + $0x30] ss:$8 sps:$4 sm:$0xff]  }
 0x35d   : > { %3638 = vmatprep.mubr.msk.bf16.mxu1 %vm3843_vm0, %v3842_v1  ;;  %3629 = vmatpush3.bf16.msra.mxu0 %v3766_v63  ;;  %v3844_v63 = vmov 0  }
 0x35e   : > { %3635 = vmatpush3.bf16.msra.mxu1 %v3767_v0  ;;  %3642 = vmatprep.subr.bf16.mxu0 %v3842_v1  ;;  %v3790_v0 = vld [vmem:[%s4651_s11 + $0x24] ss:$8 sps:$4 sm:$0xff]  }
 0x35f   : > { %3636 = vmatprep.subr.bf16.mxu1 %v3842_v1 }
 0x362   : > { %3637 = vmatpush3.bf16.msra.mxu1 %v3768_v2  ;;  %v3788_v2 = vld [vmem:[%s4651_s11 + $0x20] ss:$8 sps:$4 sm:$0xff]  }
 0x363   : > { %3650 = vmatprep.subr.bf16.mxu1 %v3842_v1 }
 0x3f8   : > { %v2170_v3 = vpop.f32.mrf.mxu0 }
 0x3f9   : > { %v2314_v5 = vpack.c.bf16 %v2170_v3, %v2170_v3  ;;  %v3793_v3 = vld [vmem:[%s4651_s11 + $0x14] ss:$8 sps:$4 sm:$0xff]  }
 0x3fa   : > { %v3606_v6 = vpop.f32.mrf.mxu0 }
 0x3fb   : > { %3631 = vmatmul.mubr.msk.bf16.vlgmr.msra.gmra.mxu0 %vm1887_vm1, %v2314_v5  ;;  %v3796_v5 = vld [vmem:[%s4651_s11 + $0x4] ss:$8 sps:$4 sm:$0xff]   ;;  %v3794_v6 = vld [vmem:[%s4651_s11] ss:$8 sps:$4 sm:$0xff]  }
 0x3fc   : > { %v2173_v7 = vpop.f32.mrf.mxu0  ;;  %v2216_v8 = vpop.f32.mrf.mxu1  ;;  %3643 = vmatpush3.bf16.msra.mxu0 %v3769_v4  ;;  %3646 = vmatprep.mubr.msk.bf16.mxu0 %vm3843_vm0, %v3842_v1  ;;  %v3791_v4 = vld [vmem:[%s4651_s11 + $0x10] ss:$8 sps:$4 sm:$0xff]  }
 0x3fd   : > { %v2315_v11 = vpack.c.bf16 %v2216_v8, %v2216_v8  ;;  %3644 = vmatprep.subr.bf16.mxu0 %v3842_v1  ;;  %v3797_v7 = vld [vmem:[%s4653_s13 + $0x78] sm:$0xff]  }
 0x3fe   : > { %v3607_v12 = vpop.f32.mrf.mxu0  ;;  %v3612_v13 = vpop.f32.mrf.mxu1  ;;  %v3798_v8 = vld [vmem:[%s4653_s13 + $0x38] sm:$0xff]  }
 0x3ff   : > { %3639 = vmatmul.mubr.msk.bf16.vlgmr.msra.gmra.mxu1 %vm1887_vm1, %v2315_v11  ;;  %v3801_v11 = vld [vmem:[%s4653_s13 + $0x68] sm:$0xff]   ;;  %v3803_v13 = vld [vmem:[%s4653_s13 + $0x60] sm:$0xff]  }
 0x400   : > { %v2219_v14 = vpop.f32.mrf.mxu1  ;;  %3645 = vmatpush3.bf16.msra.mxu0 %v3770_v9  ;;  %3651 = vmatpush3.bf16.msra.mxu1 %v3771_v10  ;;  %v3799_v9 = vld [vmem:[%s4653_s13 + $0x70] sm:$0xff]   ;;  %v3802_v12 = vld [vmem:[%s4653_s13 + $0x28] sm:$0xff]  }
 0x401   : > { %3652 = vmatprep.subr.bf16.mxu1 %v3842_v1  ;;  %3654 = vmatprep.mubr.msk.bf16.mxu1 %vm3843_vm0, %v3842_v1  ;;  %v3800_v10 = vld [vmem:[%s4653_s13 + $0x30] sm:$0xff]   ;;  %v3804_v14 = vld [vmem:[%s4653_s13 + $0x20] sm:$0xff]  }
 0x402   : > { %v3613_v16 = vpop.f32.mrf.mxu1  ;;  %2703 = vmatprep.subr.bf16.mxu0 %v3775_v50  ;;  %v3159_v50 = vld [vmem:[%s4654_s14] ss:$0 sm:$0xff] }
 0x403   : > { %v3806_v16 = vld [vmem:[%s4653_s13 + $0x18] sm:$0xff]  }
 0x404   : > { %3653 = vmatpush3.bf16.msra.mxu1 %v3772_v15  ;;  %v3805_v15 = vld [vmem:[%s4653_s13 + $0x58] sm:$0xff]  }
 0x405   : > { %3316 = vmatprep.subr.bf16.mxu1 %v3797_v7 }
 0x418   : > { %v2262_v17 = vpop.f32.mrf.mxu0 }
 0x419   : > { %v2316_v19 = vpack.c.bf16 %v2262_v17, %v2262_v17  ;;  %v3807_v17 = vld [vmem:[%s4653_s13 + $0x50] sm:$0xff]  }
 0x41a   : > { %v3618_v20 = vpop.f32.mrf.mxu0 }
 0x41b   : > { %3647 = vmatmul.mubr.msk.bf16.vlgmr.msra.gmra.mxu0 %vm1887_vm1, %v2316_v19  ;;  %v3808_v19 = vld [vmem:[%s4653_s13 + $0x10] sm:$0xff]  }
 0x41c   : > { %v2265_v21 = vpop.f32.mrf.mxu0  ;;  %v2308_v22 = vpop.f32.mrf.mxu1  ;;  %2704 = vmatpush1.bf16.msra.mxu0 %v3773_v18  ;;  %2735 = vmatprep.mubr.bf16.mxu0 %v3844_v63 }
 0x41d   : > { %v2317_v23 = vpack.c.bf16 %v2308_v22, %v2308_v22  ;;  %2705 = vmatprep.subr.bf16.mxu0 %v3778_v51 }
 0x41e   : > { %v3619_v24 = vpop.f32.mrf.mxu0  ;;  %v3624_v25 = vpop.f32.mrf.mxu1 }
 0x41f   : > { %3655 = vmatmul.mubr.msk.bf16.vlgmr.msra.gmra.mxu1 %vm1887_vm1, %v2317_v23  ;;  %v3141_v24 = vld [vmem:[%s4649_s9] ss:$0 sm:$0xff] }
 0x420   : > { %v2311_v26 = vpop.f32.mrf.mxu1  ;;  %2706 = vmatpush1.bf16.msra.mxu0 %v3776_v52  ;;  %3317 = vmatpush3.bf16.msra.mxu1 %v3798_v8 }
 0x421   : > { %2707 = vmatprep.subr.bf16.mxu0 %v3781_v57  ;;  %3318 = vmatprep.subr.bf16.mxu1 %v3799_v9  ;;  %v3142_v26 = vld [vmem:[%s4650_s10] ss:$0 sm:$0xff] }
 0x422   : > { %v3625_v27 = vpop.f32.mrf.mxu1 }
 0x424   : > { %2708 = vmatpush1.bf16.msra.mxu0 %v3779_v58  ;;  %3319 = vmatpush3.bf16.msra.mxu1 %v3800_v10 }
 0x425   : > { %2709 = vmatprep.subr.bf16.mxu0 %v3784_v60  ;;  %3320 = vmatprep.subr.bf16.mxu1 %v3801_v11 }
 0x428   : > { %2710 = vmatpush1.bf16.msra.mxu0 %v3782_v59  ;;  %3321 = vmatpush3.bf16.msra.mxu1 %v3802_v12 }
 0x429   : > { %2711 = vmatprep.subr.bf16.mxu0 %v3787_v61  ;;  %3322 = vmatprep.subr.bf16.mxu1 %v3803_v13 }
 0x42c   : > { %2712 = vmatpush1.bf16.msra.mxu0 %v3785_v62  ;;  %3323 = vmatpush3.bf16.msra.mxu1 %v3804_v14 }
 0x42d   : > { %2713 = vmatprep.subr.bf16.mxu0 %v3790_v0  ;;  %3324 = vmatprep.subr.bf16.mxu1 %v3805_v15 }
 0x430   : > { %2714 = vmatpush1.bf16.msra.mxu0 %v3788_v2  ;;  %3325 = vmatpush3.bf16.msra.mxu1 %v3806_v16  ;;  %v3176_v2 = vld [vmem:[%s4655_s15] ss:$0 sm:$0xff] }
 0x431   : > { %2715 = vmatprep.subr.bf16.mxu0 %v3793_v3  ;;  %3326 = vmatprep.subr.bf16.mxu1 %v3807_v17 }
 0x434   : > { %2716 = vmatpush1.bf16.msra.mxu0 %v3791_v4  ;;  %3327 = vmatpush3.bf16.msra.mxu1 %v3808_v19  ;;  %v3177_v4 = vld [vmem:[%s4656_s16] ss:$0 sm:$0xff] }
 0x435   : > { %2717 = vmatprep.subr.bf16.mxu0 %v3796_v5 }
 0x438   : > { %2718 = vmatpush1.bf16.msra.mxu0 %v3794_v6 }
 0x4bb   : > { %v2383_v28 = vpop.f32.mrf.mxu0 }
 0x4bd   : > { %v3632_v29 = vpop.f32.mrf.mxu0 }
 0x4bf   : > { %v2386_v30 = vpop.f32.mrf.mxu0  ;;  %v2438_v1 = vpop.f32.mrf.mxu1 }
 0x4c0   : > { %v2554_v36 = vadd.f32 %v2438_v1, %v2383_v28  ;;  %v3809_v30 = vld [vmem:[%s4653_s13 + $0x48] sm:$0xff]  }
 0x4c1   : > { %v3633_v31 = vpop.f32.mrf.mxu0  ;;  %v3640_v32 = vpop.f32.mrf.mxu1  ;;  %v3810_v1 = vld [vmem:[%s4653_s13 + $0x8] sm:$0xff]   ;;  %3328 = vmatprep.subr.bf16.mxu1 %v3809_v30 }
 0x4c2   : > { %3329 = vmatpush3.bf16.msra.mxu1 %v3810_v1  ;;  %v3811_v31 = vld [vmem:[%s4653_s13 + $0x40] sm:$0xff]  }
 0x4c3   : > { %v2441_v33 = vpop.f32.mrf.mxu1  ;;  %v3812_v32 = vld [vmem:[%s4653_s13] sm:$0xff]   ;;  %3330 = vmatprep.subr.bf16.mxu1 %v3811_v31 }
 0x4c4   : > { %v2613_v33 = vlaneseq }
 0x4c5   : > { %v3641_v34 = vpop.f32.mrf.mxu1 }
 0x4c6   : > { %3331 = vmatpush3.bf16.msra.mxu1 %v3812_v32  ;;  %v2614_v34 = vshrl.u32 %v2613_v33, 7 }
 0x4db   : > { %v2493_v35 = vpop.f32.mrf.mxu0 }
 0x4dc   : > { %v2555_v38 = vadd.f32 %v2554_v36, %v2493_v35  ;;  %v2615_v35 = vsub.s32 0, %v2614_v34  ;;  %v2611_v36 = vld [vmem:[%s4652_s12] sm:$0x3] }
 0x4dd   : > { %v3648_v37 = vpop.f32.mrf.mxu0 }
 0x4de   : > { %v2619_v37 = vsub.s32 1, %v2614_v34 }
 0x4df   : > { %v2496_v39 = vpop.f32.mrf.mxu0  ;;  %v2548_v40 = vpop.f32.mrf.mxu1 }
 0x4e0   : > { %v2556_v42 = vadd.f32 %v2555_v38, %v2548_v40  ;;  %v2616_v38 = vrot.slane %v2611_v36, %v2615_v35  ;;  %v2620_v39 = vrot.slane %v2611_v36, %v2619_v37 }
 0x4e1   : > { %v3649_v43 = vpop.f32.mrf.mxu0  ;;  %v3656_v44 = vpop.f32.mrf.mxu1 }
 0x4e2   : > { %v2564_v45 = vadd.f32 %v3140_v41, %v2556_v42 }
 0x4e3   : > { %v2551_v46 = vpop.f32.mrf.mxu1 }
 0x4e4   : > { %v2565_v48 = vadd.f32 %v3833_v47, %v2564_v45 }
 0x4e5   : > { %v3657_v49 = vpop.f32.mrf.mxu1 }
 0x4e6   : > { %2568 = vadd.xlane.f32.xlu0 %v2565_v48 }
 0x56f   : > { %v2569_v53 = vpop.xlane.xlu0 %2568 }
 0x570   : > { %v2571_v54 = vmul.f32 0.0078125, %v2569_v53 }
 0x572   : > { %v2572_v55 = vsub.f32 %v2565_v48, %v2571_v54 }
 0x574   : > { %v2573_v56 = vmul.f32 %v2572_v55, %v2572_v55 }
 0x576   : > { %2574 = vadd.xlane.f32.xlu1 %v2573_v56 }
 0x5ff   : > { %v2575_v20 = vpop.xlane.xlu1 %2574 }
 0x600   : > { %v2576_v21 = vmul.f32 0.0078125, %v2575_v20 }
 0x602   : > { %v2577_v22 = vadd.f32 1e-05, %v2576_v21 }
 0x604   : > { %3829 = vrsqrt.f32 %v2577_v22 }
 0x611   : > { %v3830_v23 = vpop.eup %3829 }
 0x612   : > { %v2579_v25 = vmul.f32 %v3830_v23, %v2572_v55 }
 0x614   : > { %v2586_v27 = vmul.f32 %v3141_v24, %v2579_v25 }
 0x616   : > { %v2593_v28 = vadd.f32 %v3142_v26, %v2586_v27 }
 0x618   : > { %v2594_v29 = vpack.c.bf16 %v2593_v28, %v2593_v28 }
 0x61a   : > { %2736 = vmatmul.mubr.bf16.vlgmr.msra.gmra.mxu0 %v2594_v29 }
 0x6da   : > { %v2737_v40 = vpop.f32.mrf.mxu0 }
 0x6db   : > { %v2738_v41 = vadd.f32 %v2737_v40, %v2616_v38 }
 0x6dc   : > { %v2739_v42 = vpop.f32.mrf.mxu0 }
 0x6dd   : > { %v2740_v43 = vadd.f32 %v2739_v42, %v2620_v39  ;;  %v2744_v44 = vmax.f32 %v2738_v41, 0.0 }
 0x6de   : > { %v2741_v45 = vpop.f32.mrf.mxu0 }
 0x6df   : > { %v2745_v46 = vmax.f32 %v2740_v43, 0.0  ;;  %v2746_v49 = vpack.c.bf16 %v2744_v44, %v2744_v44 }
 0x6e0   : > { %v2742_v47 = vpop.f32.mrf.mxu0 }
 0x6e1   : > { %v2747_v48 = vpack.c.bf16 %v2745_v46, %v2745_v46 }
 0x6e3   : > { %2915 = vmatprep.mubr.bf16.mxu1 %v2747_v48 }
 0x6e4   : > { %2916 = vmatmul.mubr.bf16.vlgmr.msra.gmra.mxu1 %v2746_v49 }
 0x7a4   : > { %v3332_v18 = vpop.f32.mrf.mxu1 }
 0x7a6   : > { %v3333_v51 = vpop.f32.mrf.mxu1 }
 0x7a7   : > { %v3334_v52 = vadd.f32 %v3333_v51, %v3332_v18 }
 0x7a8   : > { %v3335_v53 = vpop.f32.mrf.mxu1 }
 0x7a9   : > { %v2918_v54 = vadd.f32 %v3334_v52, %v3159_v50 }
 0x7aa   : > { %v3336_v55 = vpop.f32.mrf.mxu1 }
 0x7ab   : > { %v2923_v56 = vadd.f32 %v2918_v54, %v2593_v28 }
 0x7ad   : > { %2926 = vadd.xlane.f32.xlu0 %v2923_v56 }
 0x836   : > { %v2927_v57 = vpop.xlane.xlu0 %2926 }
 0x837   : > { %v2928_v58 = vmul.f32 0.0078125, %v2927_v57 }
 0x839   : > { %v2929_v59 = vsub.f32 %v2923_v56, %v2928_v58 }
 0x83b   : > { %v2930_v60 = vmul.f32 %v2929_v59, %v2929_v59 }
 0x83d   : > { %2931 = vadd.xlane.f32.xlu1 %v2930_v60 }
 0x8c6   : > { %v2932_v61 = vpop.xlane.xlu1 %2931 }
 0x8c7   : > { %v2933_v62 = vmul.f32 0.0078125, %v2932_v61 }
 0x8c9   : > { %v2934_v63 = vadd.f32 1e-05, %v2933_v62 }
 0x8cb   : > { %3831 = vrsqrt.f32 %v2934_v63 }
 0x8d8   : > { %v3832_v0 = vpop.eup %3831 }
 0x8d9   : > { %v2936_v3 = vmul.f32 %v3832_v0, %v2929_v59 }
 0x8db   : > { %v2943_v5 = vmul.f32 %v3176_v2, %v2936_v3 }
 0x8dd   : > { %v2950_v6 = vadd.f32 %v3177_v4, %v2943_v5 }
 0x8df   : > { %2951 = vst [vmem:[%s543_s18] sm:$0xff] %v2950_v6 }
 0x8e0 PF: > { %s27_s24 = sadd.s32 1, %s3840_s24  }
 0x8e1   : > { %p24_p4 = scmp.ge.s32.totalorder %s27_s24, 4  }
 0x8e3   :  { %26 = sbr.rel (!%p24_p4) target bundleno = 3 (0x3), region = 118 }

</bundles_post_ra>
